<compile_context>
chip_gen: v7x
topology: tpu7x:2x2x1
jax: 0.10.0
libtpu: 0.0.40
codegen_flags: <defaults>
</compile_context>

<pallas_src>
import jax
import jax.numpy as jnp
from jax.experimental import pallas as pl
from jax.experimental.pallas import tpu as pltpu  # noqa: F401  (TPU backend)

# ---- model dimensions (match the PyTorch module) ---------------------------
BERT_HIDDEN = 768       # self.bert.config.hidden_size
RESNET_OUT = 1000       # resnet50 classification head output
TEXT_PROJ = 256         # text_fc out
IMG_PROJ = 256          # image_fc out
HEAD_HIDDEN = 256       # classifier hidden
NUM_GENRES = 10

# ---- stub-backbone dimensions (synthetic, small) ----------------------------
VOCAB = 100
SEQ = 8
BATCH = 2
IMG_C, IMG_H, IMG_W = 3, 16, 16
PATCH = 4                                # 4x4 patches -> 16 patches/image
N_PATCH = (IMG_H // PATCH) * (IMG_W // PATCH)
PATCH_F = IMG_C * PATCH * PATCH          # 48 raw features per patch
PATCH_F_PAD = 128                        # zero-padded to a full lane tile
CNN_MID = 256                            # stub "conv" channels

# ---- padded shapes for lane/sublane-dense kernel I/O ------------------------
B_PAD = 8                                # sublane-dense row count for the head
OUT_PAD = 128                            # lane-dense logits tile (>= NUM_GENRES)
P_ROWS = BATCH * N_PATCH                 # 32 patch rows


def _full_spec(shape):
    nd = len(shape)
    return pl.BlockSpec(shape, lambda *_: (0,) * nd)


# =============================== fused Pallas kernel =========================

def _fused_forward_kernel(cls_ref, patch_ref, pool_ref,
                          we_ref, be_ref, wt_ref, bt_ref,
                          wc_ref, bc_ref, wimg_ref, bimg_ref,
                          w1t_ref, w1i_ref, b1_ref, w2_ref, b2_ref,
                          o_ref):
    bf16 = jnp.bfloat16
    f32 = jnp.float32

    # ---- text branch: stub encoder on the CLS row only ----------------------
    hs = jnp.dot(cls_ref[...].astype(bf16), we_ref[...],
                 preferred_element_type=f32) + be_ref[...]
    hs = jnp.tanh(hs)                                        # f32 elementwise
    tf = jnp.dot(hs.astype(bf16), wt_ref[...],
                 preferred_element_type=f32) + bt_ref[...]   # text_fc

    # ---- image branch: patch "conv" + avg pool + folded (resnet_fc o image_fc)
    conv = jnp.dot(patch_ref[...].astype(bf16), wc_ref[...],
                   preferred_element_type=f32) + bc_ref[...]
    conv = jnp.maximum(conv, 0.0)                            # ReLU (f32)
    pooled = jnp.dot(pool_ref[...], conv.astype(bf16),       # per-image mean
                     preferred_element_type=f32)
    imf = jnp.dot(pooled.astype(bf16), wimg_ref[...],
                  preferred_element_type=f32) + bimg_ref[...]

    # ---- fusion head: cat((tf, imf)) @ W1 == tf @ W1[:256] + imf @ W1[256:] --
    h = (jnp.dot(tf.astype(bf16), w1t_ref[...], preferred_element_type=f32)
         + jnp.dot(imf.astype(bf16), w1i_ref[...], preferred_element_type=f32)
         + b1_ref[...])
    h = jnp.maximum(h, 0.0)                                  # ReLU
    # Dropout(0.5): identity in inference mode.
    out = jnp.dot(h.astype(bf16), w2_ref[...],
                  preferred_element_type=f32) + b2_ref[...]
    o_ref[...] = out                                         # (8, 128) unmasked


def fused_forward_call(fused, cls_pad, patches_pad):
    args = (
        cls_pad, patches_pad, fused["pool"],
        fused["we"], fused["be"], fused["wt"], fused["bt"],
        fused["wc"], fused["bc"], fused["wimg"], fused["bimg"],
        fused["w1t"], fused["w1i"], fused["b1"], fused["w2"], fused["b2"],
    )
    flops = 2 * (B_PAD * BERT_HIDDEN * BERT_HIDDEN            # text encoder
                 + B_PAD * BERT_HIDDEN * TEXT_PROJ            # text_fc
                 + P_ROWS * PATCH_F_PAD * CNN_MID             # patch conv
                 + B_PAD * P_ROWS * CNN_MID                   # avg pool matmul
                 + B_PAD * CNN_MID * IMG_PROJ                 # folded image_fc
                 + 2 * B_PAD * 256 * HEAD_HIDDEN              # classifier L1
                 + B_PAD * HEAD_HIDDEN * OUT_PAD)             # classifier L2
    bytes_accessed = sum(int(a.size) * a.dtype.itemsize for a in args) \
        + B_PAD * OUT_PAD * 4
    return pl.pallas_call(
        _fused_forward_kernel,
        out_shape=jax.ShapeDtypeStruct((B_PAD, OUT_PAD), jnp.float32),
        in_specs=[_full_spec(a.shape) for a in args],
        out_specs=_full_spec((B_PAD, OUT_PAD)),
        cost_estimate=pl.CostEstimate(flops=flops,
                                      transcendentals=B_PAD * BERT_HIDDEN,
                                      bytes_accessed=bytes_accessed),
    )(*args)


# =============================== parameters =================================

def init_params(key):
    """Module-shaped parameters (f32, [in, out] layout == torch x @ W.T + b)."""
    def dense(k, fan_in, fan_out):
        return 0.02 * jax.random.normal(k, (fan_in, fan_out), jnp.float32)

    ks = jax.random.split(key, 12)
    return {
        # stub BERT encoder
        "emb": 0.02 * jax.random.normal(ks[0], (VOCAB, BERT_HIDDEN), jnp.float32),
        "we": dense(ks[1], BERT_HIDDEN, BERT_HIDDEN),
        "be": jnp.zeros((BERT_HIDDEN,), jnp.float32),
        # stub ResNet: patch "conv" + pooled FC to 1000-way logits
        "wc": dense(ks[2], PATCH_F, CNN_MID),
        "bc": jnp.zeros((CNN_MID,), jnp.float32),
        "wr": dense(ks[3], CNN_MID, RESNET_OUT),
        "br": jnp.zeros((RESNET_OUT,), jnp.float32),
        # text_fc / image_fc
        "wt": dense(ks[4], BERT_HIDDEN, TEXT_PROJ),
        "bt": jnp.zeros((TEXT_PROJ,), jnp.float32),
        "wi": dense(ks[5], RESNET_OUT, IMG_PROJ),
        "bi": jnp.zeros((IMG_PROJ,), jnp.float32),
        # classifier: Linear(512,256) split into (text, image) halves, Linear(256,G)
        "w1t": dense(ks[6], TEXT_PROJ, HEAD_HIDDEN),
        "w1i": dense(ks[7], IMG_PROJ, HEAD_HIDDEN),
        "b1": jnp.zeros((HEAD_HIDDEN,), jnp.float32),
        "w2": dense(ks[8], HEAD_HIDDEN, NUM_GENRES),
        "b2": jnp.zeros((NUM_GENRES,), jnp.float32),
    }


def prepare_params(p):
    """One-time prep: bf16 weights, zero-pad K/N dims, fold resnet_fc into image_fc."""
    bf16 = jnp.bfloat16
    f32 = jnp.float32

    # Exact fold: pooled @ wr + br then @ wi + bi  ==  pooled @ (wr@wi) + (br@wi + bi)
    # (valid only because the stub has NO nonlinearity between the two FCs).
    wimg = (p["wr"] @ p["wi"]).astype(bf16)                         # (256, 256)
    bimg = (p["br"] @ p["wi"] + p["bi"]).astype(f32)

    wc_pad = jnp.zeros((PATCH_F_PAD, CNN_MID), f32).at[:PATCH_F].set(p["wc"])
    w2_pad = jnp.zeros((HEAD_HIDDEN, OUT_PAD), f32).at[:, :NUM_GENRES].set(p["w2"])
    b2_pad = jnp.zeros((OUT_PAD,), f32).at[:NUM_GENRES].set(p["b2"])

    # Block-diagonal mean-pool matrix: pooled[b] = mean over patches of image b.
    row = jnp.arange(B_PAD)[:, None]
    col = jnp.arange(P_ROWS)[None, :]
    pool = jnp.where((col // N_PATCH) == row, 1.0 / N_PATCH, 0.0).astype(bf16)

    return {
        "emb": p["emb"],                                   # gathered outside kernel
        "pool": pool,
        "we": p["we"].astype(bf16), "be": p["be"].reshape(1, -1).astype(f32),
        "wt": p["wt"].astype(bf16), "bt": p["bt"].reshape(1, -1).astype(f32),
        "wc": wc_pad.astype(bf16), "bc": p["bc"].reshape(1, -1).astype(f32),
        "wimg": wimg, "bimg": bimg.reshape(1, -1),
        "w1t": p["w1t"].astype(bf16), "w1i": p["w1i"].astype(bf16),
        "b1": p["b1"].reshape(1, -1).astype(f32),
        "w2": w2_pad.astype(bf16), "b2": b2_pad.reshape(1, -1),
    }


# =============================== forward =====================================

def forward(fused, input_ids, attention_mask, image):
    # ---- text branch prep (CLS row only) ------------------------------------
    # TODO(synk): pretrained bert-base-uncased backbone has no clean Pallas
    # equivalent; replaced with embedding + one tanh(linear) encoder layer
    # applied to the CLS token (exact for this per-token stub encoder).
    cls_ids = input_ids[:, 0]                                        # [B]
    cls_emb = jnp.take(fused["emb"], cls_ids, axis=0)                # [B, 768]
    cls_emb = cls_emb * attention_mask[:, 0:1].astype(jnp.float32)   # mask gate
    cls_pad = jnp.pad(cls_emb, ((0, B_PAD - BATCH), (0, 0)))         # [8, 768]

    # ---- image branch prep (im2col, lane-padded) -----------------------------
    # TODO(synk): pretrained resnet50 backbone not translated; replaced with a
    # patchified conv-as-matmul + ReLU + global average pool + FC (folded).
    nhwc = jnp.transpose(image, (0, 2, 3, 1))                        # NCHW->NHWC
    patches = nhwc.reshape(BATCH, IMG_H // PATCH, PATCH,
                           IMG_W // PATCH, PATCH, IMG_C)
    patches = jnp.transpose(patches, (0, 1, 3, 2, 4, 5)).reshape(
        P_ROWS, PATCH_F)                                             # im2col [32, 48]
    patches_pad = jnp.pad(patches, ((0, 0), (0, PATCH_F_PAD - PATCH_F)))

    # ---- single fused Pallas kernel ------------------------------------------
    logits_pad = fused_forward_call(fused, cls_pad, patches_pad)     # [8, 128]
    return logits_pad[:BATCH, :NUM_GENRES]                           # [B, G]


if __name__ == "__main__":
    key = jax.random.PRNGKey(0)
    k_par, k_ids, k_img = jax.random.split(key, 3)

    params = init_params(k_par)
    fused = prepare_params(params)                  # one-time fold / pad / bf16

    input_ids = jax.random.randint(k_ids, (BATCH, SEQ), 0, VOCAB, dtype=jnp.int32)
    attention_mask = jnp.ones((BATCH, SEQ), dtype=jnp.int32)
    image = jax.random.normal(k_img, (BATCH, IMG_C, IMG_H, IMG_W), jnp.float32)

    logits = jax.jit(forward)(fused, input_ids, attention_mask, image)
    jax.block_until_ready(logits)
    assert logits.shape == (BATCH, NUM_GENRES) and logits.dtype == jnp.float32
    print("KERNEL_OK")
</pallas_src>

<mosaic_0001>
module attributes {stable_mosaic.version = 11 : i64} {
  func.func @_fused_forward_kernel(%arg0: memref<8x768xf32, #tpu.memory_space<vmem>>, %arg1: memref<32x128xf32, #tpu.memory_space<vmem>>, %arg2: memref<8x32xbf16, #tpu.memory_space<vmem>>, %arg3: memref<768x768xbf16, #tpu.memory_space<vmem>>, %arg4: memref<1x768xf32, #tpu.memory_space<vmem>>, %arg5: memref<768x256xbf16, #tpu.memory_space<vmem>>, %arg6: memref<1x256xf32, #tpu.memory_space<vmem>>, %arg7: memref<128x256xbf16, #tpu.memory_space<vmem>>, %arg8: memref<1x256xf32, #tpu.memory_space<vmem>>, %arg9: memref<256x256xbf16, #tpu.memory_space<vmem>>, %arg10: memref<1x256xf32, #tpu.memory_space<vmem>>, %arg11: memref<256x256xbf16, #tpu.memory_space<vmem>>, %arg12: memref<256x256xbf16, #tpu.memory_space<vmem>>, %arg13: memref<1x256xf32, #tpu.memory_space<vmem>>, %arg14: memref<256x128xbf16, #tpu.memory_space<vmem>>, %arg15: memref<1x128xf32, #tpu.memory_space<vmem>>, %arg16: memref<8x128xf32, #tpu.memory_space<vmem>>) attributes {dimension_semantics = [], scalar_prefetch = 0 : i64, scratch_operands = 0 : i64, tpu.core_type = #tpu.core_type<tc>} {
    %c0 = arith.constant 0 : index
    %c0_0 = arith.constant 0 : index
    %0 = vector.load %arg0[%c0, %c0_0] : memref<8x768xf32, #tpu.memory_space<vmem>>, vector<8x768xf32>
    %1 = arith.truncf %0 : vector<8x768xf32> to vector<8x768xbf16>
    %c0_1 = arith.constant 0 : index
    %c0_2 = arith.constant 0 : index
    %2 = vector.load %arg3[%c0_1, %c0_2] : memref<768x768xbf16, #tpu.memory_space<vmem>>, vector<768x768xbf16>
    %cst = arith.constant dense<0.000000e+00> : vector<8x768xf32>
    %3 = tpu.matmul %1, %2, %cst {dimension_numbers = #tpu.dot_dimension_numbers<[1], [0], [0], [1], [0, 0, 1, 1], [], []>} : vector<8x768xbf16>, vector<768x768xbf16>, vector<8x768xf32> -> vector<8x768xf32>
    %c0_3 = arith.constant 0 : index
    %c0_4 = arith.constant 0 : index
    %4 = vector.load %arg4[%c0_3, %c0_4] : memref<1x768xf32, #tpu.memory_space<vmem>>, vector<1x768xf32>
    %5 = vector.broadcast %4 : vector<1x768xf32> to vector<8x768xf32>
    %6 = arith.addf %3, %5 : vector<8x768xf32>
    %7 = math.tanh %6 : vector<8x768xf32>
    %8 = arith.truncf %7 : vector<8x768xf32> to vector<8x768xbf16>
    %c0_5 = arith.constant 0 : index
    %c0_6 = arith.constant 0 : index
    %9 = vector.load %arg5[%c0_5, %c0_6] : memref<768x256xbf16, #tpu.memory_space<vmem>>, vector<768x256xbf16>
    %cst_7 = arith.constant dense<0.000000e+00> : vector<8x256xf32>
    %10 = tpu.matmul %8, %9, %cst_7 {dimension_numbers = #tpu.dot_dimension_numbers<[1], [0], [0], [1], [0, 0, 1, 1], [], []>} : vector<8x768xbf16>, vector<768x256xbf16>, vector<8x256xf32> -> vector<8x256xf32>
    %c0_8 = arith.constant 0 : index
    %c0_9 = arith.constant 0 : index
    %11 = vector.load %arg6[%c0_8, %c0_9] : memref<1x256xf32, #tpu.memory_space<vmem>>, vector<1x256xf32>
    %12 = vector.broadcast %11 : vector<1x256xf32> to vector<8x256xf32>
    %13 = arith.addf %10, %12 : vector<8x256xf32>
    %c0_10 = arith.constant 0 : index
    %c0_11 = arith.constant 0 : index
    %14 = vector.load %arg1[%c0_10, %c0_11] : memref<32x128xf32, #tpu.memory_space<vmem>>, vector<32x128xf32>
    %15 = arith.truncf %14 : vector<32x128xf32> to vector<32x128xbf16>
    %c0_12 = arith.constant 0 : index
    %c0_13 = arith.constant 0 : index
    %16 = vector.load %arg7[%c0_12, %c0_13] : memref<128x256xbf16, #tpu.memory_space<vmem>>, vector<128x256xbf16>
    %cst_14 = arith.constant dense<0.000000e+00> : vector<32x256xf32>
    %17 = tpu.matmul %15, %16, %cst_14 {dimension_numbers = #tpu.dot_dimension_numbers<[1], [0], [0], [1], [0, 0, 1, 1], [], []>} : vector<32x128xbf16>, vector<128x256xbf16>, vector<32x256xf32> -> vector<32x256xf32>
    %c0_15 = arith.constant 0 : index
    %c0_16 = arith.constant 0 : index
    %18 = vector.load %arg8[%c0_15, %c0_16] : memref<1x256xf32, #tpu.memory_space<vmem>>, vector<1x256xf32>
    %19 = vector.broadcast %18 : vector<1x256xf32> to vector<32x256xf32>
    %20 = arith.addf %17, %19 : vector<32x256xf32>
    %cst_17 = arith.constant 0.000000e+00 : f32
    %21 = vector.broadcast %cst_17 : f32 to vector<32x256xf32>
    %22 = arith.maximumf %20, %21 : vector<32x256xf32>
    %c0_18 = arith.constant 0 : index
    %c0_19 = arith.constant 0 : index
    %23 = vector.load %arg2[%c0_18, %c0_19] : memref<8x32xbf16, #tpu.memory_space<vmem>>, vector<8x32xbf16>
    %24 = arith.truncf %22 : vector<32x256xf32> to vector<32x256xbf16>
    %cst_20 = arith.constant dense<0.000000e+00> : vector<8x256xf32>
    %25 = tpu.matmul %23, %24, %cst_20 {dimension_numbers = #tpu.dot_dimension_numbers<[1], [0], [0], [1], [0, 0, 1, 1], [], []>} : vector<8x32xbf16>, vector<32x256xbf16>, vector<8x256xf32> -> vector<8x256xf32>
    %26 = arith.truncf %25 : vector<8x256xf32> to vector<8x256xbf16>
    %c0_21 = arith.constant 0 : index
    %c0_22 = arith.constant 0 : index
    %27 = vector.load %arg9[%c0_21, %c0_22] : memref<256x256xbf16, #tpu.memory_space<vmem>>, vector<256x256xbf16>
    %cst_23 = arith.constant dense<0.000000e+00> : vector<8x256xf32>
    %28 = tpu.matmul %26, %27, %cst_23 {dimension_numbers = #tpu.dot_dimension_numbers<[1], [0], [0], [1], [0, 0, 1, 1], [], []>} : vector<8x256xbf16>, vector<256x256xbf16>, vector<8x256xf32> -> vector<8x256xf32>
    %c0_24 = arith.constant 0 : index
    %c0_25 = arith.constant 0 : index
    %29 = vector.load %arg10[%c0_24, %c0_25] : memref<1x256xf32, #tpu.memory_space<vmem>>, vector<1x256xf32>
    %30 = vector.broadcast %29 : vector<1x256xf32> to vector<8x256xf32>
    %31 = arith.addf %28, %30 : vector<8x256xf32>
    %32 = arith.truncf %13 : vector<8x256xf32> to vector<8x256xbf16>
    %c0_26 = arith.constant 0 : index
    %c0_27 = arith.constant 0 : index
    %33 = vector.load %arg11[%c0_26, %c0_27] : memref<256x256xbf16, #tpu.memory_space<vmem>>, vector<256x256xbf16>
    %cst_28 = arith.constant dense<0.000000e+00> : vector<8x256xf32>
    %34 = tpu.matmul %32, %33, %cst_28 {dimension_numbers = #tpu.dot_dimension_numbers<[1], [0], [0], [1], [0, 0, 1, 1], [], []>} : vector<8x256xbf16>, vector<256x256xbf16>, vector<8x256xf32> -> vector<8x256xf32>
    %35 = arith.truncf %31 : vector<8x256xf32> to vector<8x256xbf16>
    %c0_29 = arith.constant 0 : index
    %c0_30 = arith.constant 0 : index
    %36 = vector.load %arg12[%c0_29, %c0_30] : memref<256x256xbf16, #tpu.memory_space<vmem>>, vector<256x256xbf16>
    %cst_31 = arith.constant dense<0.000000e+00> : vector<8x256xf32>
    %37 = tpu.matmul %35, %36, %cst_31 {dimension_numbers = #tpu.dot_dimension_numbers<[1], [0], [0], [1], [0, 0, 1, 1], [], []>} : vector<8x256xbf16>, vector<256x256xbf16>, vector<8x256xf32> -> vector<8x256xf32>
    %38 = arith.addf %34, %37 : vector<8x256xf32>
    %c0_32 = arith.constant 0 : index
    %c0_33 = arith.constant 0 : index
    %39 = vector.load %arg13[%c0_32, %c0_33] : memref<1x256xf32, #tpu.memory_space<vmem>>, vector<1x256xf32>
    %40 = vector.broadcast %39 : vector<1x256xf32> to vector<8x256xf32>
    %41 = arith.addf %38, %40 : vector<8x256xf32>
    %cst_34 = arith.constant 0.000000e+00 : f32
    %42 = vector.broadcast %cst_34 : f32 to vector<8x256xf32>
    %43 = arith.maximumf %41, %42 : vector<8x256xf32>
    %44 = arith.truncf %43 : vector<8x256xf32> to vector<8x256xbf16>
    %c0_35 = arith.constant 0 : index
    %c0_36 = arith.constant 0 : index
    %45 = vector.load %arg14[%c0_35, %c0_36] : memref<256x128xbf16, #tpu.memory_space<vmem>>, vector<256x128xbf16>
    %cst_37 = arith.constant dense<0.000000e+00> : vector<8x128xf32>
    %46 = tpu.matmul %44, %45, %cst_37 {dimension_numbers = #tpu.dot_dimension_numbers<[1], [0], [0], [1], [0, 0, 1, 1], [], []>} : vector<8x256xbf16>, vector<256x128xbf16>, vector<8x128xf32> -> vector<8x128xf32>
    %c0_38 = arith.constant 0 : index
    %c0_39 = arith.constant 0 : index
    %47 = vector.load %arg15[%c0_38, %c0_39] : memref<1x128xf32, #tpu.memory_space<vmem>>, vector<1x128xf32>
    %48 = vector.broadcast %47 : vector<1x128xf32> to vector<8x128xf32>
    %49 = arith.addf %46, %48 : vector<8x128xf32>
    %c0_40 = arith.constant 0 : index
    %c0_41 = arith.constant 0 : index
    %50 = vector.load %arg16[%c0_40, %c0_41] : memref<8x128xf32, #tpu.memory_space<vmem>>, vector<8x128xf32>
    tpu.vector_store %arg16[%c0_40, %c0_41], %49 {strides = array<i32>} : memref<8x128xf32, #tpu.memory_space<vmem>>, vector<8x128xf32>,
    return
  }
}

</mosaic_0001>

<bundles_post_ra>
// kernel: forward.1
= control target key start
LH: loop header
LB: loop body
LE: loop exit
PB: predicated region body
PF: predicated region fallthrough
CT: control target
= control target key end

     0   :  { %s6576_s0 = inlined_call_operand.vmem [shape: f32[8,768], index: 0, kind: input, shape index: {}]   ;;  %s6577_s1 = inlined_call_operand.vmem [shape: f32[32,128], index: 1, kind: input, shape index: {}]   ;;  %s6578_s2 = inlined_call_operand.hbm [shape: bf16[8,32], index: 2, kind: input, shape index: {}]   ;;  %s6579_s3 = inlined_call_operand.hbm [shape: bf16[768,768], index: 3, kind: input, shape index: {}]   ;;  %s6580_s4 = inlined_call_operand.hbm [shape: f32[1,768], index: 4, kind: input, shape index: {}]   ;;  %s6581_s5 = inlined_call_operand.vmem [shape: bf16[768,256], index: 5, kind: input, shape index: {}]   ;;  %s6582_s6 = inlined_call_operand.hbm [shape: f32[1,256], index: 6, kind: input, shape index: {}]   ;;  %s6583_s7 = inlined_call_operand.hbm [shape: bf16[128,256], index: 7, kind: input, shape index: {}]   ;;  %s6584_s8 = inlined_call_operand.hbm [shape: f32[1,256], index: 8, kind: input, shape index: {}]   ;;  %s6585_s9 = inlined_call_operand.hbm [shape: bf16[256,256], index: 9, kind: input, shape index: {}]   ;;  %s6586_s10 = inlined_call_operand.hbm [shape: f32[1,256], index: 10, kind: input, shape index: {}]   ;;  %s6587_s11 = inlined_call_operand.hbm [shape: bf16[256,256], index: 11, kind: input, shape index: {}]   ;;  %s6588_s12 = inlined_call_operand.hbm [shape: bf16[256,256], index: 12, kind: input, shape index: {}]   ;;  %s6589_s13 = inlined_call_operand.hbm [shape: f32[1,256], index: 13, kind: input, shape index: {}]   ;;  %s6590_s14 = inlined_call_operand.hbm [shape: bf16[256,128], index: 14, kind: input, shape index: {}]   ;;  %s6591_s15 = inlined_call_operand.hbm [shape: f32[1,128], index: 15, kind: input, shape index: {}]   ;;  %s6592_s16 = inlined_call_operand.vmem [shape: f32[8,128], index: 16, kind: output, shape index: {}]  }
   0x1   :  { %6594 = sst [smem:[#allocation29_spill]] %s6576_s0 }
   0x2   :  { %6595 = sst [smem:[#allocation30_spill]] %s6592_s16 }
   0x3   :  { %21 = vsyncpa [#allocation3], 0 }
   0x4   :  { %22 = vsyncpa [#allocation5], 0 }
   0x5   :  { %23 = vsyncpa [#allocation8], 0 }
   0x6   :  { %24 = vsyncpa [#allocation11], 0 }
   0x7   :  { %25 = vsyncpa [#allocation14], 0 }
   0x8   :  { %26 = vsyncpa [#allocation17], 0 }
   0x9   :  { %27 = vsyncpa [#allocation20], 0  ;;  %s5895_s21 = smov [#allocation4]   ;;  %s5595_s25 = scalar_lea.hbm %s6579_s3, 36864 }
   0xa   :  { %s47_s22 = sshll.u32 %s5895_s21, 4  ;;  %p5596_p0 = scmp.ne.s32.totalorder %s6579_s3, %s5595_s25  ;;  %s48_s22 = int_to_ptr.vmem [resolvable:$true] %s47_s22 }
   0xb   :  { %p5599_p1 = scmp.lt.u32.totalorder %s5595_s25, %s6579_s3 }
   0xd   :  { %p5601_p2 = pnand %p5599_p1, %p5596_p0 }
   0xf   :  { %5604 = shalt.err (!%p5601_p2)
}
  0x10   :  { %s5605_s30 = scalar_lea.vmem %s48_s22, 36864  ;;  %p5610_p4 = scmp.lt.s32.totalorder %s48_s22, %s48_s22 }
  0x11   :  { %p5606_p3 = scmp.ne.s32.totalorder %s48_s22, %s5605_s30  ;;  %p5611_p5 = scmp.lt.s32.totalorder %s5605_s30, %s5605_s30 }
  0x13   :  { %p5612_p6 = por %p5611_p5, %p5610_p4 }
  0x15   :  { %p5613_p7 = pnand %p5612_p6, %p5606_p3 }
  0x17   :  { %5616 = shalt.err (!%p5613_p7)
}
  0x18   :  { %s5896_s0 = smov 384   ;;  %s5897_s17 = smov 24  }
  0x19   :  { %53 = dma.hbm_to_vmem [thread:$0]  %s6579_s3, 36864, %s48_s22, [#allocation5], %s5896_s0, %s5896_s0, %s5897_s17  }
  0x1a   :  { %s5898_s20 = smov [#allocation7]   ;;  %s5899_s23 = smov [#allocation10]  }
  0x1b   :  { %s72_s21 = sshll.u32 %s5898_s20, 4  ;;  %s94_s24 = sshll.u32 %s5899_s23, 4  ;;  %s73_s21 = int_to_ptr.vmem [resolvable:$true] %s72_s21  ;;  %s95_s24 = int_to_ptr.vmem [resolvable:$true] %s94_s24 }
  0x1c   :  { %s5617_s27 = scalar_lea.hbm %s6582_s6, 32 }
  0x1d   :  { %p5618_p8 = scmp.ne.s32.totalorder %s6582_s6, %s5617_s27  ;;  %p5621_p9 = scmp.lt.u32.totalorder %s5617_s27, %s6582_s6 }
  0x1f   :  { %p5623_p10 = pnand %p5621_p9, %p5618_p8 }
  0x21   :  { %5626 = shalt.err (!%p5623_p10)
}
  0x22   :  { %s5627_s3 = scalar_lea.vmem %s73_s21, 32  ;;  %p5632_p12 = scmp.lt.s32.totalorder %s73_s21, %s73_s21 }
  0x23   :  { %p5628_p11 = scmp.ne.s32.totalorder %s73_s21, %s5627_s3  ;;  %p5633_p13 = scmp.lt.s32.totalorder %s5627_s3, %s5627_s3 }
  0x25   :  { %p5634_p0 = por %p5633_p13, %p5632_p12 }
  0x27   :  { %p5635_p1 = pnand %p5634_p0, %p5628_p11 }
  0x29   :  { %5638 = shalt.err (!%p5635_p1)
}
  0x2a   :  { %75 = dma.hbm_to_vmem [thread:$0]  %s6582_s6, 32, %s73_s21, [#allocation8]  }
  0x2b   :  { %s5639_s19 = scalar_lea.hbm %s6584_s8, 32 }
  0x2c   :  { %p5640_p2 = scmp.ne.s32.totalorder %s6584_s8, %s5639_s19  ;;  %p5643_p3 = scmp.lt.u32.totalorder %s5639_s19, %s6584_s8 }
  0x2e   :  { %p5645_p4 = pnand %p5643_p3, %p5640_p2 }
  0x30   :  { %5648 = shalt.err (!%p5645_p4)
}
  0x31   :  { %s5649_s26 = scalar_lea.vmem %s95_s24, 32  ;;  %p5654_p6 = scmp.lt.s32.totalorder %s95_s24, %s95_s24 }
  0x32   :  { %p5650_p5 = scmp.ne.s32.totalorder %s95_s24, %s5649_s26  ;;  %p5655_p7 = scmp.lt.s32.totalorder %s5649_s26, %s5649_s26 }
  0x34   :  { %p5656_p8 = por %p5655_p7, %p5654_p6 }
  0x36   :  { %p5657_p9 = pnand %p5656_p8, %p5650_p5 }
  0x38   :  { %5660 = shalt.err (!%p5657_p9)
}
  0x39   :  { %97 = dma.hbm_to_vmem [thread:$0]  %s6584_s8, 32, %s95_s24, [#allocation11]  }
  0x3a   :  { %s5900_s27 = smov [#allocation13]   ;;  %s5661_s3 = scalar_lea.hbm %s6586_s10, 32 }
  0x3b   :  { %s116_s28 = sshll.u32 %s5900_s27, 4  ;;  %p5662_p10 = scmp.ne.s32.totalorder %s6586_s10, %s5661_s3  ;;  %s117_s28 = int_to_ptr.vmem [resolvable:$true] %s116_s28 }
  0x3c   :  { %p5665_p11 = scmp.lt.u32.totalorder %s5661_s3, %s6586_s10 }
  0x3e   :  { %p5667_p12 = pnand %p5665_p11, %p5662_p10 }
  0x40   :  { %5670 = shalt.err (!%p5667_p12)
}
  0x41   :  { %s5671_s19 = scalar_lea.vmem %s117_s28, 32  ;;  %p5676_p0 = scmp.lt.s32.totalorder %s117_s28, %s117_s28 }
  0x42   :  { %p5672_p13 = scmp.ne.s32.totalorder %s117_s28, %s5671_s19  ;;  %p5677_p1 = scmp.lt.s32.totalorder %s5671_s19, %s5671_s19 }
  0x44   :  { %p5678_p2 = por %p5677_p1, %p5676_p0 }
  0x46   :  { %p5679_p3 = pnand %p5678_p2, %p5672_p13 }
  0x48   :  { %5682 = shalt.err (!%p5679_p3)
}
  0x49   :  { %119 = dma.hbm_to_vmem [thread:$0]  %s6586_s10, 32, %s117_s28, [#allocation14]  }
  0x4a   :  { %s5901_s16 = smov [#allocation16]   ;;  %s5902_s23 = smov [#allocation19]  }
  0x4b   :  { %s137_s20 = sshll.u32 %s5901_s16, 4  ;;  %s159_s25 = sshll.u32 %s5902_s23, 4  ;;  %s138_s20 = int_to_ptr.vmem [resolvable:$true] %s137_s20  ;;  %s6048_s25 = int_to_ptr.vmem [resolvable:$true] %s159_s25 }
  0x4c   :  { %s5683_s21 = scalar_lea.hbm %s6588_s12, 4096 }
  0x4d   :  { %p5684_p4 = scmp.ne.s32.totalorder %s6588_s12, %s5683_s21  ;;  %p5687_p5 = scmp.lt.u32.totalorder %s5683_s21, %s6588_s12 }
  0x4f   :  { %p5689_p6 = pnand %p5687_p5, %p5684_p4 }
  0x51   :  { %5692 = shalt.err (!%p5689_p6)
}
  0x52   :  { %s5693_s10 = scalar_lea.vmem %s138_s20, 4096  ;;  %p5698_p8 = scmp.lt.s32.totalorder %s138_s20, %s138_s20 }
  0x53   :  { %p5694_p7 = scmp.ne.s32.totalorder %s138_s20, %s5693_s10  ;;  %p5699_p9 = scmp.lt.s32.totalorder %s5693_s10, %s5693_s10 }
  0x55   :  { %p5700_p10 = por %p5699_p9, %p5698_p8 }
  0x57   :  { %p5701_p11 = pnand %p5700_p10, %p5694_p7 }
  0x59   :  { %5704 = shalt.err (!%p5701_p11)
}
  0x5a   :  { %s5903_s28 = smov 128   ;;  %s5904_s22 = smov 8  }
  0x5b   :  { %143 = dma.hbm_to_vmem [thread:$0]  %s6588_s12, 4096, %s138_s20, [#allocation17], %s5903_s28, %s5903_s28, %s5904_s22  }
  0x5c   :  { %s5705_s8 = scalar_lea.hbm %s6590_s14, 2048 }
  0x5d   :  { %p5706_p12 = scmp.ne.s32.totalorder %s6590_s14, %s5705_s8  ;;  %p5709_p13 = scmp.lt.u32.totalorder %s5705_s8, %s6590_s14 }
  0x5f   :  { %p5711_p0 = pnand %p5709_p13, %p5706_p12 }
  0x61   :  { %5714 = shalt.err (!%p5711_p0)
}
  0x62   :  { %s5715_s6 = scalar_lea.vmem %s6048_s25, 2048  ;;  %p5720_p2 = scmp.lt.s32.totalorder %s6048_s25, %s6048_s25 }
  0x63   :  { %p5716_p1 = scmp.ne.s32.totalorder %s6048_s25, %s5715_s6  ;;  %p5721_p3 = scmp.lt.s32.totalorder %s5715_s6, %s5715_s6 }
  0x65   :  { %p5722_p4 = por %p5721_p3, %p5720_p2 }
  0x67   :  { %p5723_p5 = pnand %p5722_p4, %p5716_p1 }
  0x69   :  { %5726 = shalt.err (!%p5723_p5)
}
  0x6a   :  { %s5905_s12 = smov 64   ;;  %s5906_s20 = smov 4  }
  0x6b   :  { %165 = dma.hbm_to_vmem [thread:$0]  %s6590_s14, 2048, %s6048_s25, [#allocation20], %s5905_s12, %s5905_s12, %s5906_s20  }
  0x6c   :  { %s5907_s29 = smov [#allocation2]   ;;  %s5908_s3 = smov [#allocation6]  }
  0x6d   :  { %s38_s30 = sshll.u32 %s5907_s29, 4  ;;  %s60_s10 = sshll.u32 %s5908_s3, 4  ;;  %s39_s30 = int_to_ptr.vmem [resolvable:$true] %s38_s30  ;;  %s61_s10 = int_to_ptr.vmem [resolvable:$true] %s60_s10 }
  0x6e   :  { %s5727_s18 = scalar_lea.hbm %s6578_s2, 64 }
  0x6f   :  { %p5728_p6 = scmp.ne.s32.totalorder %s6578_s2, %s5727_s18  ;;  %p5731_p7 = scmp.lt.u32.totalorder %s5727_s18, %s6578_s2 }
  0x71   :  { %p5733_p8 = pnand %p5731_p7, %p5728_p6 }
  0x73   :  { %5736 = shalt.err (!%p5733_p8)
}
  0x74   :  { %s5737_s14 = scalar_lea.vmem %s39_s30, 64  ;;  %p5742_p10 = scmp.lt.s32.totalorder %s39_s30, %s39_s30 }
  0x75   :  { %p5738_p9 = scmp.ne.s32.totalorder %s39_s30, %s5737_s14  ;;  %p5743_p11 = scmp.lt.s32.totalorder %s5737_s14, %s5737_s14 }
  0x77   :  { %p5744_p12 = por %p5743_p11, %p5742_p10 }
  0x79   :  { %p5745_p13 = pnand %p5744_p12, %p5738_p9 }
  0x7b   :  { %5748 = shalt.err (!%p5745_p13)
}
  0x7c   :  { %41 = dma.hbm_to_vmem [thread:$0]  %s6578_s2, 64, %s39_s30, [#allocation3]  }
  0x7d   :  { %s5749_s12 = scalar_lea.hbm %s6580_s4, 96 }
  0x7e   :  { %p5750_p0 = scmp.ne.s32.totalorder %s6580_s4, %s5749_s12  ;;  %p5753_p1 = scmp.lt.u32.totalorder %s5749_s12, %s6580_s4 }
  0x80   :  { %p5755_p2 = pnand %p5753_p1, %p5750_p0 }
  0x82   :  { %5758 = shalt.err (!%p5755_p2)
}
  0x83   :  { %s5759_s3 = scalar_lea.vmem %s61_s10, 96  ;;  %p5764_p4 = scmp.lt.s32.totalorder %s61_s10, %s61_s10 }
  0x84   :  { %p5760_p3 = scmp.ne.s32.totalorder %s61_s10, %s5759_s3  ;;  %p5765_p5 = scmp.lt.s32.totalorder %s5759_s3, %s5759_s3 }
  0x86   :  { %p5766_p6 = por %p5765_p5, %p5764_p4 }
  0x88   :  { %p5767_p7 = pnand %p5766_p6, %p5760_p3 }
  0x8a   :  { %5770 = shalt.err (!%p5767_p7)
}
  0x8b   :  { %63 = dma.hbm_to_vmem [thread:$0]  %s6580_s4, 96, %s61_s10, [#allocation5]  }
  0x8c   :  { %s5909_s0 = smov [#allocation9]   ;;  %s5910_s18 = smov [#allocation12]  }
  0x8d   :  { %s81_s17 = sshll.u32 %s5909_s0, 4  ;;  %s103_s19 = sshll.u32 %s5910_s18, 4  ;;  %s82_s17 = int_to_ptr.vmem [resolvable:$true] %s81_s17  ;;  %s6106_s19 = int_to_ptr.vmem [resolvable:$true] %s103_s19 }
  0x8e   :  { %s5771_s16 = scalar_lea.hbm %s6583_s7, 2048 }
  0x8f   :  { %p5772_p8 = scmp.ne.s32.totalorder %s6583_s7, %s5771_s16  ;;  %p5775_p9 = scmp.lt.u32.totalorder %s5771_s16, %s6583_s7 }
  0x91   :  { %p5777_p10 = pnand %p5775_p9, %p5772_p8 }
  0x93   :  { %5780 = shalt.err (!%p5777_p10)
}
  0x94   :  { %s5781_s4 = scalar_lea.vmem %s82_s17, 2048  ;;  %p5786_p12 = scmp.lt.s32.totalorder %s82_s17, %s82_s17 }
  0x95   :  { %p5782_p11 = scmp.ne.s32.totalorder %s82_s17, %s5781_s4  ;;  %p5787_p13 = scmp.lt.s32.totalorder %s5781_s4, %s5781_s4 }
  0x97   :  { %p5788_p0 = por %p5787_p13, %p5786_p12 }
  0x99   :  { %p5789_p1 = pnand %p5788_p0, %p5782_p11 }
  0x9b   :  { %5792 = shalt.err (!%p5789_p1)
}
  0x9c   :  { %87 = dma.hbm_to_vmem [thread:$0]  %s6583_s7, 2048, %s82_s17, [#allocation8], %s5903_s28, %s5903_s28, %s5904_s22  }
  0x9d   :  { %s5793_s21 = scalar_lea.hbm %s6585_s9, 4096 }
  0x9e   :  { %p5794_p2 = scmp.ne.s32.totalorder %s6585_s9, %s5793_s21  ;;  %p5797_p3 = scmp.lt.u32.totalorder %s5793_s21, %s6585_s9 }
  0xa0   :  { %p5799_p4 = pnand %p5797_p3, %p5794_p2 }
  0xa2   :  { %5802 = shalt.err (!%p5799_p4)
}
  0xa3   :  { %s5803_s30 = scalar_lea.vmem %s6106_s19, 4096  ;;  %p5808_p6 = scmp.lt.s32.totalorder %s6106_s19, %s6106_s19 }
  0xa4   :  { %p5804_p5 = scmp.ne.s32.totalorder %s6106_s19, %s5803_s30  ;;  %p5809_p7 = scmp.lt.s32.totalorder %s5803_s30, %s5803_s30 }
  0xa6   :  { %p5810_p8 = por %p5809_p7, %p5808_p6 }
  0xa8   :  { %p5811_p9 = pnand %p5810_p8, %p5804_p5 }
  0xaa   :  { %5814 = shalt.err (!%p5811_p9)
}
  0xab   :  { %109 = dma.hbm_to_vmem [thread:$0]  %s6585_s9, 4096, %s6106_s19, [#allocation11], %s5903_s28, %s5903_s28, %s5904_s22  }
  0xac   :  { %s5911_s17 = smov [#allocation15]   ;;  %s5912_s8 = smov [#allocation18]  }
  0xad   :  { %s125_s18 = sshll.u32 %s5911_s17, 4  ;;  %s150_s24 = sshll.u32 %s5912_s8, 4  ;;  %s126_s18 = int_to_ptr.vmem [resolvable:$true] %s125_s18  ;;  %s151_s24 = int_to_ptr.vmem [resolvable:$true] %s150_s24 }
  0xae   :  { %s5815_s25 = scalar_lea.hbm %s6587_s11, 4096 }
  0xaf   :  { %p5816_p10 = scmp.ne.s32.totalorder %s6587_s11, %s5815_s25  ;;  %p5819_p11 = scmp.lt.u32.totalorder %s5815_s25, %s6587_s11 }
  0xb1   :  { %p5821_p12 = pnand %p5819_p11, %p5816_p10 }
  0xb3   :  { %5824 = shalt.err (!%p5821_p12)
}
  0xb4   :  { %s5825_s9 = scalar_lea.vmem %s126_s18, 4096  ;;  %p5830_p0 = scmp.lt.s32.totalorder %s126_s18, %s126_s18 }
  0xb5   :  { %p5826_p13 = scmp.ne.s32.totalorder %s126_s18, %s5825_s9  ;;  %p5831_p1 = scmp.lt.s32.totalorder %s5825_s9, %s5825_s9 }
  0xb7   :  { %p5832_p2 = por %p5831_p1, %p5830_p0 }
  0xb9   :  { %p5833_p3 = pnand %p5832_p2, %p5826_p13 }
  0xbb   :  { %5836 = shalt.err (!%p5833_p3)
}
  0xbc   :  { %131 = dma.hbm_to_vmem [thread:$0]  %s6587_s11, 4096, %s126_s18, [#allocation14], %s5903_s28, %s5903_s28, %s5904_s22  }
  0xbd   :  { %s5837_s21 = scalar_lea.hbm %s6589_s13, 32 }
  0xbe   :  { %p5838_p4 = scmp.ne.s32.totalorder %s6589_s13, %s5837_s21  ;;  %p5841_p5 = scmp.lt.u32.totalorder %s5837_s21, %s6589_s13 }
  0xc0   :  { %p5843_p6 = pnand %p5841_p5, %p5838_p4 }
  0xc2   :  { %5846 = shalt.err (!%p5843_p6)
}
  0xc3   :  { %s5847_s30 = scalar_lea.vmem %s151_s24, 32  ;;  %p5852_p8 = scmp.lt.s32.totalorder %s151_s24, %s151_s24 }
  0xc4   :  { %p5848_p7 = scmp.ne.s32.totalorder %s151_s24, %s5847_s30  ;;  %p5853_p9 = scmp.lt.s32.totalorder %s5847_s30, %s5847_s30 }
  0xc6   :  { %p5854_p10 = por %p5853_p9, %p5852_p8 }
  0xc8   :  { %p5855_p11 = pnand %p5854_p10, %p5848_p7 }
  0xca   :  { %5858 = shalt.err (!%p5855_p11)
}
  0xcb   :  { %153 = dma.hbm_to_vmem [thread:$0]  %s6589_s13, 32, %s151_s24, [#allocation17]  }
  0xcc   :  { %s5913_s22 = smov [#allocation21]   ;;  %s5859_s18 = scalar_lea.hbm %s6591_s15, 16 }
  0xcd   :  { %s172_s7 = sshll.u32 %s5913_s22, 4  ;;  %p5860_p12 = scmp.ne.s32.totalorder %s6591_s15, %s5859_s18  ;;  %s173_s7 = int_to_ptr.vmem [resolvable:$true] %s172_s7 }
  0xce   :  { %p5863_p13 = scmp.lt.u32.totalorder %s5859_s18, %s6591_s15 }
  0xd0   :  { %p5865_p0 = pnand %p5863_p13, %p5860_p12 }
  0xd2   :  { %5868 = shalt.err (!%p5865_p0)
}
  0xd3   :  { %s5869_s23 = scalar_lea.vmem %s173_s7, 16  ;;  %s5873_s13 = scalar_lea.vmem %s173_s7, 32 }
  0xd4   :  { %p5870_p1 = scmp.ne.s32.totalorder %s173_s7, %s5869_s23  ;;  %p5874_p2 = scmp.lt.s32.totalorder %s173_s7, %s173_s7 }
  0xd5   :  { %p5875_p3 = scmp.lt.s32.totalorder %s5873_s13, %s5869_s23 }
  0xd7   :  { %p5876_p4 = por %p5875_p3, %p5874_p2 }
  0xd9   :  { %p5877_p5 = pnand %p5876_p4, %p5870_p1 }
  0xdb   :  { %5880 = shalt.err (!%p5877_p5)
}
  0xdc   :  { %175 = dma.hbm_to_vmem [thread:$0]  %s6591_s15, 16, %s173_s7, [#allocation20]  }
  0xdd   :  { %5881 = dma.done.wait [#allocation3], 64  }
  0xde   :  { %5882 = vsyncadd [#allocation3], 4294967232 }
  0xdf   :  { %5883 = dma.done.wait [#allocation5], 36960  }
  0xe0   :  { %5884 = vsyncadd [#allocation5], 4294930336 }
  0xe1   :  { %5885 = dma.done.wait [#allocation8], 2080  }
  0xe2   :  { %5886 = vsyncadd [#allocation8], 4294965216 }
  0xe3   :  { %5887 = dma.done.wait [#allocation11], 4128  }
  0xe4   :  { %5888 = vsyncadd [#allocation11], 4294963168 }
  0xe5   :  { %5889 = dma.done.wait [#allocation14], 4128  }
  0xe6   :  { %5890 = vsyncadd [#allocation14], 4294963168 }
  0xe7   :  { %5891 = dma.done.wait [#allocation17], 4128  }
  0xe8   :  { %5892 = vsyncadd [#allocation17], 4294963168 }
  0xe9   :  { %5893 = dma.done.wait [#allocation20], 2064  }
  0xea   :  { %5894 = vsyncadd [#allocation20], 4294965232  ;;  %v4823_v0 = vld [vmem:[#allocation4 + $0x4] ss:$24 sps:$4 sm:$0xff]   ;;  %v4825_v1 = vld [vmem:[#allocation4] ss:$24 sps:$4 sm:$0xff]  }
  0xeb   :  { %1988 = vmatprep.subr.bf16.mxu0 %v4823_v0  ;;  %v4826_v2 = vld [vmem:[#allocation4 + $0x34] ss:$24 sps:$4 sm:$0xff]   ;;  %v4828_v3 = vld [vmem:[#allocation4 + $0x30] ss:$24 sps:$4 sm:$0xff]   ;;  %v4829_v4 = vld [vmem:[#allocation4 + $0x64] ss:$24 sps:$4 sm:$0xff]  }
  0xec   :  { %1989 = vmatpush1.bf16.msra.mxu0 %v4825_v1  ;;  %v4831_v5 = vld [vmem:[#allocation4 + $0x60] ss:$24 sps:$4 sm:$0xff]   ;;  %v4832_v6 = vld [vmem:[#allocation4 + $0x94] ss:$24 sps:$4 sm:$0xff]   ;;  %v4834_v8 = vld [vmem:[#allocation4 + $0x90] ss:$24 sps:$4 sm:$0xff]  }
  0xed   :  { %1990 = vmatprep.subr.bf16.mxu0 %v4826_v2  ;;  %v4844_v7 = vld [vmem:[#allocation4 + $0xc] ss:$24 sps:$4 sm:$0xff]   ;;  %v4848_v10 = vld [vmem:[#allocation4 + $0x8] ss:$24 sps:$4 sm:$0xff]   ;;  %v4850_v11 = vld [vmem:[#allocation4 + $0x3c] ss:$24 sps:$4 sm:$0xff]  }
  0xee   :  { %v4835_v9 = vld [vmem:[#allocation4 + $0xc4] ss:$24 sps:$4 sm:$0xff]   ;;  %2111 = vmatprep.subr.bf16.mxu1 %v4844_v7  ;;  %v4837_v12 = vld [vmem:[#allocation4 + $0xc0] ss:$24 sps:$4 sm:$0xff]   ;;  %v4838_v15 = vld [vmem:[#allocation4 + $0xf4] ss:$24 sps:$4 sm:$0xff]  }
  0xef   :  { %2112 = vmatpush1.bf16.msra.mxu1 %v4848_v10  ;;  %v4854_v13 = vld [vmem:[#allocation4 + $0x38] ss:$24 sps:$4 sm:$0xff]   ;;  %v4856_v14 = vld [vmem:[#allocation4 + $0x6c] ss:$24 sps:$4 sm:$0xff]   ;;  %v4860_v16 = vld [vmem:[#allocation4 + $0x68] ss:$24 sps:$4 sm:$0xff]  }
  0xf0   :  { %1991 = vmatpush1.bf16.msra.mxu0 %v4828_v3  ;;  %2113 = vmatprep.subr.bf16.mxu1 %v4850_v11  ;;  %v4862_v17 = vld [vmem:[#allocation4 + $0x9c] ss:$24 sps:$4 sm:$0xff]   ;;  %v4840_v18 = vld [vmem:[#allocation4 + $0xf0] ss:$24 sps:$4 sm:$0xff]   ;;  %v4868_v21 = vld [vmem:[#allocation4 + $0xcc] ss:$24 sps:$4 sm:$0xff]  }
  0xf1   :  { %1992 = vmatprep.subr.bf16.mxu0 %v4829_v4  ;;  %v4841_v19 = vld [vmem:[#allocation4 + $0x124] ss:$24 sps:$4 sm:$0xff]   ;;  %v4866_v20 = vld [vmem:[#allocation4 + $0x98] ss:$24 sps:$4 sm:$0xff]   ;;  %v4846_v23 = vld [vmem:[#allocation4 + $0x154] ss:$24 sps:$4 sm:$0xff]  }
  0xf2   :  { %v4843_v22 = vld [vmem:[#allocation4 + $0x120] ss:$24 sps:$4 sm:$0xff]   ;;  %v4874_v25 = vld [vmem:[#allocation4 + $0xfc] ss:$24 sps:$4 sm:$0xff]   ;;  %v4849_v26 = vld [vmem:[#allocation4 + $0x150] ss:$24 sps:$4 sm:$0xff]  }
  0xf3   :  { %2114 = vmatpush1.bf16.msra.mxu1 %v4854_v13  ;;  %v4872_v24 = vld [vmem:[#allocation4 + $0xc8] ss:$24 sps:$4 sm:$0xff]   ;;  %v4852_v27 = vld [vmem:[#allocation4 + $0x184] ss:$24 sps:$4 sm:$0xff]   ;;  %v4878_v28 = vld [vmem:[#allocation4 + $0xf8] ss:$24 sps:$4 sm:$0xff]  }
  0xf4   :  { %1993 = vmatpush1.bf16.msra.mxu0 %v4831_v5  ;;  %2115 = vmatprep.subr.bf16.mxu1 %v4856_v14  ;;  %v4880_v29 = vld [vmem:[#allocation4 + $0x12c] ss:$24 sps:$4 sm:$0xff]   ;;  %v4855_v30 = vld [vmem:[#allocation4 + $0x180] ss:$24 sps:$4 sm:$0xff]   ;;  %v4886_v33 = vld [vmem:[#allocation4 + $0x15c] ss:$24 sps:$4 sm:$0xff]  }
  0xf5   :  { %1994 = vmatprep.subr.bf16.mxu0 %v4832_v6  ;;  %v4858_v31 = vld [vmem:[#allocation4 + $0x1b4] ss:$24 sps:$4 sm:$0xff]   ;;  %v4884_v32 = vld [vmem:[#allocation4 + $0x128] ss:$24 sps:$4 sm:$0xff]   ;;  %s6596_s10 = sld [smem:[#allocation29_spill]]  ;;  %vm3260_vm0 = vcmask 261120  }
  0xf6   :  { %v4861_v35 = vld [vmem:[#allocation4 + $0x1b0] ss:$24 sps:$4 sm:$0xff]   ;;  %v4864_v37 = vld [vmem:[#allocation4 + $0x1e4] ss:$24 sps:$4 sm:$0xff]   ;;  %v4867_v40 = vld [vmem:[#allocation4 + $0x1e0] ss:$24 sps:$4 sm:$0xff]  }
  0xf7   :  { %2116 = vmatpush1.bf16.msra.mxu1 %v4860_v16  ;;  %v4890_v38 = vld [vmem:[#allocation4 + $0x158] ss:$24 sps:$4 sm:$0xff]   ;;  %v4892_v39 = vld [vmem:[#allocation4 + $0x18c] ss:$24 sps:$4 sm:$0xff]   ;;  %v4896_v42 = vld [vmem:[#allocation4 + $0x188] ss:$24 sps:$4 sm:$0xff]  }
  0xf8   :  { %1995 = vmatpush1.bf16.msra.mxu0 %v4834_v8  ;;  %2117 = vmatprep.subr.bf16.mxu1 %v4862_v17  ;;  %v4870_v41 = vld [vmem:[#allocation4 + $0x214] ss:$24 sps:$4 sm:$0xff]   ;;  %v4873_v44 = vld [vmem:[#allocation4 + $0x210] ss:$24 sps:$4 sm:$0xff]   ;;  %v4876_v45 = vld [vmem:[#allocation4 + $0x244] ss:$24 sps:$4 sm:$0xff]  }
  0xf9   :  { %1996 = vmatprep.subr.bf16.mxu0 %v4835_v9  ;;  %v4898_v43 = vld [vmem:[#allocation4 + $0x1bc] ss:$24 sps:$4 sm:$0xff]   ;;  %v4903_v46 = vld [vmem:[#allocation4 + $0x1b8] ss:$24 sps:$4 sm:$0xff]   ;;  %v4904_v47 = vld [vmem:[#allocation4 + $0x1ec] ss:$24 sps:$4 sm:$0xff]  }
  0xfa   :  { %v4879_v48 = vld [vmem:[#allocation4 + $0x240] ss:$24 sps:$4 sm:$0xff]   ;;  %v4882_v49 = vld [vmem:[#allocation4 + $0x274] ss:$24 sps:$4 sm:$0xff]   ;;  %v4885_v52 = vld [vmem:[#allocation4 + $0x270] ss:$24 sps:$4 sm:$0xff]  }
  0xfb   :  { %2118 = vmatpush1.bf16.msra.mxu1 %v4866_v20  ;;  %v217_v34 = vld [vmem:[%s6596_s10 + $0x8] sm:$0xff]  ;;  %v4910_v51 = vld [vmem:[#allocation4 + $0x21c] ss:$24 sps:$4 sm:$0xff]   ;;  %v4915_v54 = vld [vmem:[#allocation4 + $0x218] ss:$24 sps:$4 sm:$0xff]   ;;  %s6597_s12 = sld [smem:[#allocation30_spill]] }
  0xfc   :  { %1997 = vmatpush1.bf16.msra.mxu0 %v4837_v12  ;;  %2119 = vmatprep.subr.bf16.mxu1 %v4868_v21  ;;  %v6185_v36 = vpack.c.bf16 %v217_v34, %v217_v34  ;;  %v4909_v50 = vld [vmem:[#allocation4 + $0x1e8] ss:$24 sps:$4 sm:$0xff]   ;;  %v4888_v53 = vld [vmem:[#allocation4 + $0x2a4] ss:$24 sps:$4 sm:$0xff]   ;;  %v4894_v57 = vld [vmem:[#allocation4 + $0x2d4] ss:$24 sps:$4 sm:$0xff]  }
  0xfd   :  { %1998 = vmatprep.subr.bf16.mxu0 %v4838_v15  ;;  %v4916_v55 = vld [vmem:[#allocation4 + $0x24c] ss:$24 sps:$4 sm:$0xff]   ;;  %v4891_v56 = vld [vmem:[#allocation4 + $0x2a0] ss:$24 sps:$4 sm:$0xff]   ;;  %v4897_v58 = vld [vmem:[#allocation4 + $0x2d0] ss:$24 sps:$4 sm:$0xff]  }
  0xfe   :  { %2020 = vmatprep.mubr.bf16.mxu0 %v6185_v36  ;;  %2143 = vmatprep.mubr.bf16.mxu1 %v6185_v36  ;;  %v4921_v59 = vld [vmem:[#allocation4 + $0x248] ss:$24 sps:$4 sm:$0xff]   ;;  %v4922_v60 = vld [vmem:[#allocation4 + $0x27c] ss:$24 sps:$4 sm:$0xff]   ;;  %v4927_v63 = vld [vmem:[#allocation4 + $0x278] ss:$24 sps:$4 sm:$0xff]  }
  0xff   :  { %2120 = vmatpush1.bf16.msra.mxu1 %v4872_v24  ;;  %v216_v61 = vld [vmem:[%s6596_s10] sm:$0xff]  ;;  %v4928_v1 = vld [vmem:[#allocation4 + $0x2ac] ss:$24 sps:$4 sm:$0xff]   ;;  %v4906_v6 = vld [vmem:[#allocation4 + $0x330] ss:$24 sps:$4 sm:$0xff]  }
 0x100   :  { %1999 = vmatpush1.bf16.msra.mxu0 %v4840_v18  ;;  %2121 = vmatprep.subr.bf16.mxu1 %v4874_v25  ;;  %v4902_v62 = vld [vmem:[#allocation4 + $0x304] ss:$24 sps:$4 sm:$0xff]   ;;  %v6192_v0 = vpack.c.bf16 %v216_v61, %v216_v61  ;;  %v4900_v2 = vld [vmem:[#allocation4 + $0x300] ss:$24 sps:$4 sm:$0xff]   ;;  %v4908_v3 = vld [vmem:[#allocation4 + $0x334] ss:$24 sps:$4 sm:$0xff]  }
 0x101   :  { %2000 = vmatprep.subr.bf16.mxu0 %v4841_v19  ;;  %v4933_v4 = vld [vmem:[#allocation4 + $0x2a8] ss:$24 sps:$4 sm:$0xff]   ;;  %v4934_v5 = vld [vmem:[#allocation4 + $0x2dc] ss:$24 sps:$4 sm:$0xff]   ;;  %v4939_v8 = vld [vmem:[#allocation4 + $0x2d8] ss:$24 sps:$4 sm:$0xff]  }
 0x102   :  { %v4914_v7 = vld [vmem:[#allocation4 + $0x364] ss:$24 sps:$4 sm:$0xff]   ;;  %v4912_v10 = vld [vmem:[#allocation4 + $0x360] ss:$24 sps:$4 sm:$0xff]   ;;  %v4920_v11 = vld [vmem:[#allocation4 + $0x394] ss:$24 sps:$4 sm:$0xff]  }
 0x103   :  { %2122 = vmatpush1.bf16.msra.mxu1 %v4878_v28  ;;  %v4942_v9 = vld [vmem:[#allocation4 + $0x30c] ss:$24 sps:$4 sm:$0xff]   ;;  %v4940_v12 = vld [vmem:[#allocation4 + $0x308] ss:$24 sps:$4 sm:$0xff]   ;;  %v4948_v13 = vld [vmem:[#allocation4 + $0x33c] ss:$24 sps:$4 sm:$0xff]  }
 0x104   :  { %2001 = vmatpush1.bf16.msra.mxu0 %v4843_v22  ;;  %2123 = vmatprep.subr.bf16.mxu1 %v4880_v29  ;;  %v4918_v14 = vld [vmem:[#allocation4 + $0x390] ss:$24 sps:$4 sm:$0xff]   ;;  %v4926_v15 = vld [vmem:[#allocation4 + $0x3c4] ss:$24 sps:$4 sm:$0xff]   ;;  %v219_v18 = vld [vmem:[%s6596_s10 + $0x18] sm:$0xff] }
 0x105   :  { %2002 = vmatprep.subr.bf16.mxu0 %v4846_v23  ;;  %v4946_v16 = vld [vmem:[#allocation4 + $0x338] ss:$24 sps:$4 sm:$0xff]   ;;  %v4954_v17 = vld [vmem:[#allocation4 + $0x36c] ss:$24 sps:$4 sm:$0xff]   ;;  %v6199_v20 = vpack.c.bf16 %v219_v18, %v219_v18  ;;  %v4952_v22 = vld [vmem:[#allocation4 + $0x368] ss:$24 sps:$4 sm:$0xff]  }
 0x106   :  { %v4924_v19 = vld [vmem:[#allocation4 + $0x3c0] ss:$24 sps:$4 sm:$0xff]   ;;  %v4932_v21 = vld [vmem:[#allocation4 + $0x3f4] ss:$24 sps:$4 sm:$0xff]   ;;  %v4930_v24 = vld [vmem:[#allocation4 + $0x3f0] ss:$24 sps:$4 sm:$0xff]  }
 0x107   :  { %2124 = vmatpush1.bf16.msra.mxu1 %v4884_v32  ;;  %v4960_v23 = vld [vmem:[#allocation4 + $0x39c] ss:$24 sps:$4 sm:$0xff]   ;;  %v4936_v28 = vld [vmem:[#allocation4 + $0x420] ss:$24 sps:$4 sm:$0xff]   ;;  %v4943_v32 = vld [vmem:[#allocation4 + $0x450] ss:$24 sps:$4 sm:$0xff]  }
 0x108   :  { %2003 = vmatpush1.bf16.msra.mxu0 %v4849_v26  ;;  %2125 = vmatprep.subr.bf16.mxu1 %v4886_v33  ;;  %v4938_v25 = vld [vmem:[#allocation4 + $0x424] ss:$24 sps:$4 sm:$0xff]   ;;  %v4958_v26 = vld [vmem:[#allocation4 + $0x398] ss:$24 sps:$4 sm:$0xff]   ;;  %v4945_v29 = vld [vmem:[#allocation4 + $0x454] ss:$24 sps:$4 sm:$0xff]  }
 0x109   :  { %2004 = vmatprep.subr.bf16.mxu0 %v4852_v27  ;;  %v4966_v27 = vld [vmem:[#allocation4 + $0x3cc] ss:$24 sps:$4 sm:$0xff]   ;;  %v4970_v34 = vld [vmem:[#allocation4 + $0x3f8] ss:$24 sps:$4 sm:$0xff]  }
 0x10a   :  { %v4951_v33 = vld [vmem:[#allocation4 + $0x484] ss:$24 sps:$4 sm:$0xff]   ;;  %v4985_v61 = vld [vmem:[#allocation4 + $0x5a0] ss:$24 sps:$4 sm:$0xff]  }
 0x10b   :  { %2126 = vmatpush1.bf16.msra.mxu1 %v4890_v38  ;;  %v4957_v38 = vld [vmem:[#allocation4 + $0x4b4] ss:$24 sps:$4 sm:$0xff]   ;;  %v5009_v18 = vld [vmem:[#allocation4 + $0x660] ss:$24 sps:$4 sm:$0xff]  }
 0x10c   :  { %2005 = vmatpush1.bf16.msra.mxu0 %v4855_v30  ;;  %2127 = vmatprep.subr.bf16.mxu1 %v4892_v39  ;;  %v4964_v30 = vld [vmem:[#allocation4 + $0x3c8] ss:$24 sps:$4 sm:$0xff]  }
 0x10d   :  { %2006 = vmatprep.subr.bf16.mxu0 %v4858_v31  ;;  %v4972_v31 = vld [vmem:[#allocation4 + $0x3fc] ss:$24 sps:$4 sm:$0xff]   ;;  %v4976_v39 = vld [vmem:[#allocation4 + $0x428] ss:$24 sps:$4 sm:$0xff]  }
 0x10f   :  { %2128 = vmatpush1.bf16.msra.mxu1 %v4896_v42  ;;  %v4963_v42 = vld [vmem:[#allocation4 + $0x4e4] ss:$24 sps:$4 sm:$0xff]  }
 0x110   :  { %2007 = vmatpush1.bf16.msra.mxu0 %v4861_v35  ;;  %2129 = vmatprep.subr.bf16.mxu1 %v4898_v43  ;;  %v4978_v35 = vld [vmem:[#allocation4 + $0x42c] ss:$24 sps:$4 sm:$0xff]   ;;  %v4982_v43 = vld [vmem:[#allocation4 + $0x458] ss:$24 sps:$4 sm:$0xff]  }
 0x111   :  { %2008 = vmatprep.subr.bf16.mxu0 %v4864_v37  ;;  %v4949_v37 = vld [vmem:[#allocation4 + $0x480] ss:$24 sps:$4 sm:$0xff]  }
 0x113   :  { %2130 = vmatpush1.bf16.msra.mxu1 %v4903_v46  ;;  %v4969_v46 = vld [vmem:[#allocation4 + $0x514] ss:$24 sps:$4 sm:$0xff]  }
 0x114   :  { %2009 = vmatpush1.bf16.msra.mxu0 %v4867_v40  ;;  %2131 = vmatprep.subr.bf16.mxu1 %v4904_v47  ;;  %v4984_v40 = vld [vmem:[#allocation4 + $0x45c] ss:$24 sps:$4 sm:$0xff]   ;;  %v4988_v47 = vld [vmem:[#allocation4 + $0x488] ss:$24 sps:$4 sm:$0xff]  }
 0x115   :  { %2010 = vmatprep.subr.bf16.mxu0 %v4870_v41  ;;  %v4955_v41 = vld [vmem:[#allocation4 + $0x4b0] ss:$24 sps:$4 sm:$0xff]  }
 0x117   :  { %2132 = vmatpush1.bf16.msra.mxu1 %v4909_v50  ;;  %v4975_v50 = vld [vmem:[#allocation4 + $0x544] ss:$24 sps:$4 sm:$0xff]  }
 0x118   :  { %2011 = vmatpush1.bf16.msra.mxu0 %v4873_v44  ;;  %2133 = vmatprep.subr.bf16.mxu1 %v4910_v51  ;;  %v4990_v44 = vld [vmem:[#allocation4 + $0x48c] ss:$24 sps:$4 sm:$0xff]   ;;  %v4994_v51 = vld [vmem:[#allocation4 + $0x4b8] ss:$24 sps:$4 sm:$0xff]  }
 0x119   :  { %2012 = vmatprep.subr.bf16.mxu0 %v4876_v45  ;;  %v4961_v45 = vld [vmem:[#allocation4 + $0x4e0] ss:$24 sps:$4 sm:$0xff]  }
 0x11b   :  { %2134 = vmatpush1.bf16.msra.mxu1 %v4915_v54  ;;  %v4981_v54 = vld [vmem:[#allocation4 + $0x574] ss:$24 sps:$4 sm:$0xff]  }
 0x11c   :  { %2013 = vmatpush1.bf16.msra.mxu0 %v4879_v48  ;;  %2135 = vmatprep.subr.bf16.mxu1 %v4916_v55  ;;  %v4996_v48 = vld [vmem:[#allocation4 + $0x4bc] ss:$24 sps:$4 sm:$0xff]   ;;  %v5000_v55 = vld [vmem:[#allocation4 + $0x4e8] ss:$24 sps:$4 sm:$0xff]  }
 0x11d   :  { %2014 = vmatprep.subr.bf16.mxu0 %v4882_v49  ;;  %v4967_v49 = vld [vmem:[#allocation4 + $0x510] ss:$24 sps:$4 sm:$0xff]  }
 0x11f   :  { %2136 = vmatpush1.bf16.msra.mxu1 %v4921_v59  ;;  %v5006_v59 = vld [vmem:[#allocation4 + $0x518] ss:$24 sps:$4 sm:$0xff]  }
 0x120   :  { %2015 = vmatpush1.bf16.msra.mxu0 %v4885_v52  ;;  %2137 = vmatprep.subr.bf16.mxu1 %v4922_v60  ;;  %v5002_v52 = vld [vmem:[#allocation4 + $0x4ec] ss:$24 sps:$4 sm:$0xff]  }
 0x121   :  { %2016 = vmatprep.subr.bf16.mxu0 %v4888_v53  ;;  %v4973_v53 = vld [vmem:[#allocation4 + $0x540] ss:$24 sps:$4 sm:$0xff]   ;;  %v5014_v60 = vld [vmem:[#allocation4 + $0x54c] ss:$24 sps:$4 sm:$0xff]  }
 0x123   :  { %2138 = vmatpush1.bf16.msra.mxu1 %v4927_v63  ;;  %v4991_v63 = vld [vmem:[#allocation4 + $0x5d0] ss:$24 sps:$4 sm:$0xff]  }
 0x124   :  { %2017 = vmatpush1.bf16.msra.mxu0 %v4891_v56  ;;  %2139 = vmatprep.subr.bf16.mxu1 %v4928_v1  ;;  %v5008_v56 = vld [vmem:[#allocation4 + $0x51c] ss:$24 sps:$4 sm:$0xff]   ;;  %v5012_v1 = vld [vmem:[#allocation4 + $0x548] ss:$24 sps:$4 sm:$0xff]  }
 0x125   :  { %2018 = vmatprep.subr.bf16.mxu0 %v4894_v57  ;;  %v4979_v57 = vld [vmem:[#allocation4 + $0x570] ss:$24 sps:$4 sm:$0xff]  }
 0x127   :  { %2140 = vmatpush1.bf16.msra.mxu1 %v4933_v4  ;;  %v4999_v4 = vld [vmem:[#allocation4 + $0x604] ss:$24 sps:$4 sm:$0xff]  }
 0x128   :  { %2019 = vmatpush1.bf16.msra.mxu0 %v4897_v58  ;;  %2141 = vmatprep.subr.bf16.mxu1 %v4934_v5  ;;  %v4987_v58 = vld [vmem:[#allocation4 + $0x5a4] ss:$24 sps:$4 sm:$0xff]  }
 0x129   :  { %2029 = vmatprep.subr.bf16.mxu0 %v4902_v62  ;;  %v4993_v62 = vld [vmem:[#allocation4 + $0x5d4] ss:$24 sps:$4 sm:$0xff]   ;;  %v221_v5 = vld [vmem:[%s6596_s10 + $0x28] sm:$0xff] }
 0x12b   :  { %2021 = vmatmul.mubr.bf16.vlgmr.msra.gmra.mrb[0].mxu0 %v6192_v0  ;;  %2142 = vmatpush1.bf16.msra.mxu1 %v4939_v8  ;;  %v5026_v8 = vld [vmem:[#allocation4 + $0x5ac] ss:$24 sps:$4 sm:$0xff]  }
 0x12c   :  { %2030 = vmatpush1.bf16.msra.mxu0 %v4900_v2  ;;  %2152 = vmatprep.subr.bf16.mxu1 %v4942_v9  ;;  %v5020_v2 = vld [vmem:[#allocation4 + $0x57c] ss:$24 sps:$4 sm:$0xff]   ;;  %v4997_v9 = vld [vmem:[#allocation4 + $0x600] ss:$24 sps:$4 sm:$0xff]  }
 0x12d   :  { %2031 = vmatprep.subr.bf16.mxu0 %v4908_v3  ;;  %2061 = vmatprep.mubr.bf16.mxu0 %v6199_v20  ;;  %v218_v3 = vld [vmem:[%s6596_s10 + $0x10] sm:$0xff] }
 0x12e   :  { %2144 = vmatmul.mubr.bf16.vlgmr.msra.gmra.mrb[0].mxu1 %v6192_v0 }
 0x12f   :  { %2153 = vmatpush1.bf16.msra.mxu1 %v4940_v12  ;;  %2184 = vmatprep.mubr.bf16.mxu1 %v6199_v20  ;;  %v5024_v12 = vld [vmem:[#allocation4 + $0x5a8] ss:$24 sps:$4 sm:$0xff]  }
 0x130   :  { %2032 = vmatpush1.bf16.msra.mxu0 %v4906_v6  ;;  %2154 = vmatprep.subr.bf16.mxu1 %v4948_v13  ;;  %v5018_v6 = vld [vmem:[#allocation4 + $0x578] ss:$24 sps:$4 sm:$0xff]   ;;  %v5032_v13 = vld [vmem:[#allocation4 + $0x5dc] ss:$24 sps:$4 sm:$0xff]  }
 0x131   :  { %2033 = vmatprep.subr.bf16.mxu0 %v4914_v7  ;;  %v6209_v7 = vpack.c.bf16 %v218_v3, %v218_v3  ;;  %v5102_v3 = vld [vmem:[#allocation4 + $0x818] ss:$24 sps:$4 sm:$0xff]  }
 0x133   :  { %2155 = vmatpush1.bf16.msra.mxu1 %v4946_v16  ;;  %v5030_v16 = vld [vmem:[#allocation4 + $0x5d8] ss:$24 sps:$4 sm:$0xff]  }
 0x134   :  { %2034 = vmatpush1.bf16.msra.mxu0 %v4912_v10  ;;  %2156 = vmatprep.subr.bf16.mxu1 %v4954_v17  ;;  %v6211_v10 = vpack.c.bf16 %v221_v5, %v221_v5  ;;  %v5038_v17 = vld [vmem:[#allocation4 + $0x60c] ss:$24 sps:$4 sm:$0xff]   ;;  %v5081_v5 = vld [vmem:[#allocation4 + $0x8a0] ss:$24 sps:$4 sm:$0xff]  }
 0x135   :  { %2035 = vmatprep.subr.bf16.mxu0 %v4920_v11  ;;  %v5005_v11 = vld [vmem:[#allocation4 + $0x634] ss:$24 sps:$4 sm:$0xff]  }
 0x137   :  { %2157 = vmatpush1.bf16.msra.mxu1 %v4952_v22  ;;  %v5044_v22 = vld [vmem:[#allocation4 + $0x63c] ss:$24 sps:$4 sm:$0xff]  }
 0x138   :  { %2036 = vmatpush1.bf16.msra.mxu0 %v4918_v14  ;;  %2158 = vmatprep.subr.bf16.mxu1 %v4960_v23  ;;  %v5003_v14 = vld [vmem:[#allocation4 + $0x630] ss:$24 sps:$4 sm:$0xff]  }
 0x139   :  { %2037 = vmatprep.subr.bf16.mxu0 %v4926_v15  ;;  %v5011_v15 = vld [vmem:[#allocation4 + $0x664] ss:$24 sps:$4 sm:$0xff]   ;;  %v5015_v23 = vld [vmem:[#allocation4 + $0x690] ss:$24 sps:$4 sm:$0xff]  }
 0x13b   :  { %2159 = vmatpush1.bf16.msra.mxu1 %v4958_v26  ;;  %v5050_v26 = vld [vmem:[#allocation4 + $0x66c] ss:$24 sps:$4 sm:$0xff]  }
 0x13c   :  { %2038 = vmatpush1.bf16.msra.mxu0 %v4924_v19  ;;  %2160 = vmatprep.subr.bf16.mxu1 %v4966_v27  ;;  %v5017_v19 = vld [vmem:[#allocation4 + $0x694] ss:$24 sps:$4 sm:$0xff]   ;;  %v5021_v27 = vld [vmem:[#allocation4 + $0x6c0] ss:$24 sps:$4 sm:$0xff]  }
 0x13d   :  { %2039 = vmatprep.subr.bf16.mxu0 %v4932_v21  ;;  %v5036_v21 = vld [vmem:[#allocation4 + $0x608] ss:$24 sps:$4 sm:$0xff]  }
 0x13f   :  { %2161 = vmatpush1.bf16.msra.mxu1 %v4964_v30  ;;  %v5056_v30 = vld [vmem:[#allocation4 + $0x69c] ss:$24 sps:$4 sm:$0xff]  }
 0x140   :  { %2040 = vmatpush1.bf16.msra.mxu0 %v4930_v24  ;;  %2162 = vmatprep.subr.bf16.mxu1 %v4972_v31  ;;  %v5023_v24 = vld [vmem:[#allocation4 + $0x6c4] ss:$24 sps:$4 sm:$0xff]   ;;  %v5027_v31 = vld [vmem:[#allocation4 + $0x6f0] ss:$24 sps:$4 sm:$0xff]  }
 0x141   :  { %2041 = vmatprep.subr.bf16.mxu0 %v4938_v25  ;;  %v5042_v25 = vld [vmem:[#allocation4 + $0x638] ss:$24 sps:$4 sm:$0xff]  }
 0x143   :  { %2163 = vmatpush1.bf16.msra.mxu1 %v4970_v34  ;;  %v5062_v34 = vld [vmem:[#allocation4 + $0x6cc] ss:$24 sps:$4 sm:$0xff]  }
 0x144   :  { %2042 = vmatpush1.bf16.msra.mxu0 %v4936_v28  ;;  %2164 = vmatprep.subr.bf16.mxu1 %v4978_v35  ;;  %v5029_v28 = vld [vmem:[#allocation4 + $0x6f4] ss:$24 sps:$4 sm:$0xff]   ;;  %v5033_v35 = vld [vmem:[#allocation4 + $0x720] ss:$24 sps:$4 sm:$0xff]  }
 0x145   :  { %2043 = vmatprep.subr.bf16.mxu0 %v4945_v29  ;;  %v5048_v29 = vld [vmem:[#allocation4 + $0x668] ss:$24 sps:$4 sm:$0xff]  }
 0x147   :  { %2165 = vmatpush1.bf16.msra.mxu1 %v4976_v39  ;;  %v5068_v39 = vld [vmem:[#allocation4 + $0x6fc] ss:$24 sps:$4 sm:$0xff]  }
 0x148   :  { %2044 = vmatpush1.bf16.msra.mxu0 %v4943_v32  ;;  %2166 = vmatprep.subr.bf16.mxu1 %v4984_v40  ;;  %v5035_v32 = vld [vmem:[#allocation4 + $0x724] ss:$24 sps:$4 sm:$0xff]   ;;  %v5039_v40 = vld [vmem:[#allocation4 + $0x750] ss:$24 sps:$4 sm:$0xff]  }
 0x149   :  { %2045 = vmatprep.subr.bf16.mxu0 %v4951_v33  ;;  %v5054_v33 = vld [vmem:[#allocation4 + $0x698] ss:$24 sps:$4 sm:$0xff]  }
 0x14b   :  { %2167 = vmatpush1.bf16.msra.mxu1 %v4982_v43  ;;  %v5074_v43 = vld [vmem:[#allocation4 + $0x72c] ss:$24 sps:$4 sm:$0xff]  }
 0x14c   :  { %2046 = vmatpush1.bf16.msra.mxu0 %v4949_v37  ;;  %2168 = vmatprep.subr.bf16.mxu1 %v4990_v44  ;;  %v5041_v37 = vld [vmem:[#allocation4 + $0x754] ss:$24 sps:$4 sm:$0xff]   ;;  %v5045_v44 = vld [vmem:[#allocation4 + $0x780] ss:$24 sps:$4 sm:$0xff]  }
 0x14d   :  { %2047 = vmatprep.subr.bf16.mxu0 %v4957_v38  ;;  %v5060_v38 = vld [vmem:[#allocation4 + $0x6c8] ss:$24 sps:$4 sm:$0xff]  }
 0x14f   :  { %2169 = vmatpush1.bf16.msra.mxu1 %v4988_v47  ;;  %v5072_v47 = vld [vmem:[#allocation4 + $0x728] ss:$24 sps:$4 sm:$0xff]  }
 0x150   :  { %2048 = vmatpush1.bf16.msra.mxu0 %v4955_v41  ;;  %2170 = vmatprep.subr.bf16.mxu1 %v4996_v48  ;;  %v5047_v41 = vld [vmem:[#allocation4 + $0x784] ss:$24 sps:$4 sm:$0xff]  }
 0x151   :  { %2049 = vmatprep.subr.bf16.mxu0 %v4963_v42  ;;  %v5066_v42 = vld [vmem:[#allocation4 + $0x6f8] ss:$24 sps:$4 sm:$0xff]   ;;  %v5080_v48 = vld [vmem:[#allocation4 + $0x75c] ss:$24 sps:$4 sm:$0xff]  }
 0x153   :  { %2171 = vmatpush1.bf16.msra.mxu1 %v4994_v51  ;;  %v5086_v51 = vld [vmem:[#allocation4 + $0x78c] ss:$24 sps:$4 sm:$0xff]  }
 0x154   :  { %2050 = vmatpush1.bf16.msra.mxu0 %v4961_v45  ;;  %2172 = vmatprep.subr.bf16.mxu1 %v5002_v52  ;;  %v5053_v45 = vld [vmem:[#allocation4 + $0x7b4] ss:$24 sps:$4 sm:$0xff]   ;;  %v5057_v52 = vld [vmem:[#allocation4 + $0x7e0] ss:$24 sps:$4 sm:$0xff]  }
 0x155   :  { %2051 = vmatprep.subr.bf16.mxu0 %v4969_v46  ;;  %v5051_v46 = vld [vmem:[#allocation4 + $0x7b0] ss:$24 sps:$4 sm:$0xff]  }
 0x157   :  { %2173 = vmatpush1.bf16.msra.mxu1 %v5000_v55  ;;  %v5092_v55 = vld [vmem:[#allocation4 + $0x7bc] ss:$24 sps:$4 sm:$0xff]  }
 0x158   :  { %2052 = vmatpush1.bf16.msra.mxu0 %v4967_v49  ;;  %2174 = vmatprep.subr.bf16.mxu1 %v5008_v56  ;;  %v5059_v49 = vld [vmem:[#allocation4 + $0x7e4] ss:$24 sps:$4 sm:$0xff]   ;;  %v5063_v56 = vld [vmem:[#allocation4 + $0x810] ss:$24 sps:$4 sm:$0xff]  }
 0x159   :  { %2053 = vmatprep.subr.bf16.mxu0 %v4975_v50  ;;  %v5078_v50 = vld [vmem:[#allocation4 + $0x758] ss:$24 sps:$4 sm:$0xff]  }
 0x15b   :  { %2175 = vmatpush1.bf16.msra.mxu1 %v5006_v59  ;;  %v5098_v59 = vld [vmem:[#allocation4 + $0x7ec] ss:$24 sps:$4 sm:$0xff]  }
 0x15c   :  { %2054 = vmatpush1.bf16.msra.mxu0 %v4973_v53  ;;  %2176 = vmatprep.subr.bf16.mxu1 %v5014_v60  ;;  %v5065_v53 = vld [vmem:[#allocation4 + $0x814] ss:$24 sps:$4 sm:$0xff]   ;;  %v5069_v60 = vld [vmem:[#allocation4 + $0x840] ss:$24 sps:$4 sm:$0xff]  }
 0x15d   :  { %2055 = vmatprep.subr.bf16.mxu0 %v4981_v54  ;;  %v5084_v54 = vld [vmem:[#allocation4 + $0x788] ss:$24 sps:$4 sm:$0xff]  }
 0x15f   :  { %2177 = vmatpush1.bf16.msra.mxu1 %v5012_v1  ;;  %v5075_v1 = vld [vmem:[#allocation4 + $0x870] ss:$24 sps:$4 sm:$0xff]  }
 0x160   :  { %2056 = vmatpush1.bf16.msra.mxu0 %v4979_v57  ;;  %2178 = vmatprep.subr.bf16.mxu1 %v5020_v2  ;;  %v5071_v57 = vld [vmem:[#allocation4 + $0x844] ss:$24 sps:$4 sm:$0xff]  }
 0x161   :  { %2057 = vmatprep.subr.bf16.mxu0 %v4987_v58  ;;  %v5090_v58 = vld [vmem:[#allocation4 + $0x7b8] ss:$24 sps:$4 sm:$0xff]   ;;  %v5083_v2 = vld [vmem:[#allocation4 + $0x8a4] ss:$24 sps:$4 sm:$0xff]  }
 0x163   :  { %2179 = vmatpush1.bf16.msra.mxu1 %v5018_v6  ;;  %v5089_v6 = vld [vmem:[#allocation4 + $0x8d4] ss:$24 sps:$4 sm:$0xff]  }
 0x164   :  { %2058 = vmatpush1.bf16.msra.mxu0 %v4985_v61  ;;  %2180 = vmatprep.subr.bf16.mxu1 %v5026_v8  ;;  %v5077_v61 = vld [vmem:[#allocation4 + $0x874] ss:$24 sps:$4 sm:$0xff]   ;;  %v5108_v8 = vld [vmem:[#allocation4 + $0x848] ss:$24 sps:$4 sm:$0xff]  }
 0x165   :  { %2059 = vmatprep.subr.bf16.mxu0 %v4993_v62  ;;  %v5096_v62 = vld [vmem:[#allocation4 + $0x7e8] ss:$24 sps:$4 sm:$0xff]  }
 0x167   :  { %2181 = vmatpush1.bf16.msra.mxu1 %v5024_v12  ;;  %v220_v12 = vld [vmem:[%s6596_s10 + $0x20] sm:$0xff] }
 0x168   :  { %2060 = vmatpush1.bf16.msra.mxu0 %v4991_v63  ;;  %2182 = vmatprep.subr.bf16.mxu1 %v5032_v13  ;;  %v5104_v63 = vld [vmem:[#allocation4 + $0x81c] ss:$24 sps:$4 sm:$0xff]  }
 0x169   :  { %2070 = vmatprep.subr.bf16.mxu0 %v4999_v4  ;;  %v5110_v4 = vld [vmem:[#allocation4 + $0x84c] ss:$24 sps:$4 sm:$0xff]  }
 0x16a   :  { %v5095_v13 = vld [vmem:[#allocation4 + $0x14] ss:$24 sps:$4 sm:$0xff]  }
 0x16b   :  { %2062 = vmatmul.mubr.bf16.vlgmr.msra.gmra.mrb[0].mxu0 %v6209_v7  ;;  %2183 = vmatpush1.bf16.msra.mxu1 %v5030_v16  ;;  %v5093_v16 = vld [vmem:[#allocation4 + $0x10] ss:$24 sps:$4 sm:$0xff]  }
 0x16c   :  { %2071 = vmatpush1.bf16.msra.mxu0 %v4997_v9  ;;  %2102 = vmatprep.mubr.bf16.mxu0 %v6211_v10  ;;  %v5116_v9 = vld [vmem:[#allocation4 + $0x87c] ss:$24 sps:$4 sm:$0xff]  }
 0x16d   :  { %2072 = vmatprep.subr.bf16.mxu0 %v5005_v11  ;;  %2193 = vmatprep.subr.bf16.mxu1 %v5038_v17  ;;  %v5087_v11 = vld [vmem:[#allocation4 + $0x8d0] ss:$24 sps:$4 sm:$0xff]   ;;  %v6220_v17 = vpack.c.bf16 %v220_v12, %v220_v12 }
 0x16e   :  { %2185 = vmatmul.mubr.bf16.vlgmr.msra.gmra.mrb[0].mxu1 %v6209_v7  ;;  %v5284_v12 = vld [vmem:[%s6581_s5 + $0x84] ss:$8 sps:$4 sm:$0xff]  }
 0x16f   :  { %2194 = vmatpush1.bf16.msra.mxu1 %v5036_v21  ;;  %2225 = vmatprep.mubr.bf16.mxu1 %v6211_v10  ;;  %v5128_v21 = vld [vmem:[#allocation4 + $0x8dc] ss:$24 sps:$4 sm:$0xff]  }
 0x170   :  { %2073 = vmatpush1.bf16.msra.mxu0 %v5003_v14  ;;  %2195 = vmatprep.subr.bf16.mxu1 %v5044_v22  ;;  %v5114_v14 = vld [vmem:[#allocation4 + $0x878] ss:$24 sps:$4 sm:$0xff]  }
 0x171   :  { %2074 = vmatprep.subr.bf16.mxu0 %v5011_v15  ;;  %v5122_v15 = vld [vmem:[#allocation4 + $0x8ac] ss:$24 sps:$4 sm:$0xff]   ;;  %v5099_v22 = vld [vmem:[#allocation4 + $0x40] ss:$24 sps:$4 sm:$0xff]  }
 0x173   :  { %2196 = vmatpush1.bf16.msra.mxu1 %v5042_v25  ;;  %v5105_v25 = vld [vmem:[#allocation4 + $0x70] ss:$24 sps:$4 sm:$0xff]  }
 0x174   :  { %2075 = vmatpush1.bf16.msra.mxu0 %v5009_v18  ;;  %2197 = vmatprep.subr.bf16.mxu1 %v5050_v26  ;;  %v5101_v18 = vld [vmem:[#allocation4 + $0x44] ss:$24 sps:$4 sm:$0xff]  }
 0x175   :  { %2076 = vmatprep.subr.bf16.mxu0 %v5017_v19  ;;  %v5120_v19 = vld [vmem:[#allocation4 + $0x8a8] ss:$24 sps:$4 sm:$0xff]   ;;  %v5113_v26 = vld [vmem:[#allocation4 + $0xa4] ss:$24 sps:$4 sm:$0xff]  }
 0x177   :  { %2198 = vmatpush1.bf16.msra.mxu1 %v5048_v29  ;;  %v5117_v29 = vld [vmem:[#allocation4 + $0xd0] ss:$24 sps:$4 sm:$0xff]  }
 0x178   :  { %2077 = vmatpush1.bf16.msra.mxu0 %v5015_v23  ;;  %2199 = vmatprep.subr.bf16.mxu1 %v5056_v30  ;;  %v5107_v23 = vld [vmem:[#allocation4 + $0x74] ss:$24 sps:$4 sm:$0xff]   ;;  %v5125_v30 = vld [vmem:[#allocation4 + $0x104] ss:$24 sps:$4 sm:$0xff]  }
 0x179   :  { %2078 = vmatprep.subr.bf16.mxu0 %v5023_v24  ;;  %v5126_v24 = vld [vmem:[#allocation4 + $0x8d8] ss:$24 sps:$4 sm:$0xff]  }
 0x17b   :  { %2200 = vmatpush1.bf16.msra.mxu1 %v5054_v33  ;;  %v5134_v33 = vld [vmem:[#allocation4 + $0x164] ss:$24 sps:$4 sm:$0xff]  }
 0x17c   :  { %2079 = vmatpush1.bf16.msra.mxu0 %v5021_v27  ;;  %2201 = vmatprep.subr.bf16.mxu1 %v5062_v34  ;;  %v5111_v27 = vld [vmem:[#allocation4 + $0xa0] ss:$24 sps:$4 sm:$0xff]  }
 0x17d   :  { %2080 = vmatprep.subr.bf16.mxu0 %v5029_v28  ;;  %v5119_v28 = vld [vmem:[#allocation4 + $0xd4] ss:$24 sps:$4 sm:$0xff]   ;;  %v5132_v34 = vld [vmem:[#allocation4 + $0x160] ss:$24 sps:$4 sm:$0xff]  }
 0x17f   :  { %2202 = vmatpush1.bf16.msra.mxu1 %v5060_v38  ;;  %v5140_v38 = vld [vmem:[#allocation4 + $0x1c4] ss:$24 sps:$4 sm:$0xff]  }
 0x180   :  { %2081 = vmatpush1.bf16.msra.mxu0 %v5027_v31  ;;  %2203 = vmatprep.subr.bf16.mxu1 %v5068_v39  ;;  %v5131_v31 = vld [vmem:[#allocation4 + $0x134] ss:$24 sps:$4 sm:$0xff]   ;;  %v5138_v39 = vld [vmem:[#allocation4 + $0x1c0] ss:$24 sps:$4 sm:$0xff]  }
 0x181   :  { %2082 = vmatprep.subr.bf16.mxu0 %v5035_v32  ;;  %v5129_v32 = vld [vmem:[#allocation4 + $0x130] ss:$24 sps:$4 sm:$0xff]  }
 0x183   :  { %2204 = vmatpush1.bf16.msra.mxu1 %v5066_v42  ;;  %v5239_v42 = vld [vmem:[%s6581_s5 + $0x4] ss:$8 sps:$4 sm:$0xff]  }
 0x184   :  { %2083 = vmatpush1.bf16.msra.mxu0 %v5033_v35  ;;  %2205 = vmatprep.subr.bf16.mxu1 %v5074_v43  ;;  %v5137_v35 = vld [vmem:[#allocation4 + $0x194] ss:$24 sps:$4 sm:$0xff]   ;;  %v5141_v43 = vld [vmem:[#allocation4 + $0x1f0] ss:$24 sps:$4 sm:$0xff]  }
 0x185   :  { %2084 = vmatprep.subr.bf16.mxu0 %v5041_v37  ;;  %v5135_v37 = vld [vmem:[#allocation4 + $0x190] ss:$24 sps:$4 sm:$0xff]  }
 0x187   :  { %2206 = vmatpush1.bf16.msra.mxu1 %v5072_v47  ;;  %v5144_v47 = vld [vmem:[#allocation4 + $0x220] ss:$24 sps:$4 sm:$0xff]  }
 0x188   :  { %2085 = vmatpush1.bf16.msra.mxu0 %v5039_v40  ;;  %2207 = vmatprep.subr.bf16.mxu1 %v5080_v48  ;;  %v5143_v40 = vld [vmem:[#allocation4 + $0x1f4] ss:$24 sps:$4 sm:$0xff]  }
 0x189   :  { %2086 = vmatprep.subr.bf16.mxu0 %v5047_v41  ;;  %v5237_v41 = vld [vmem:[%s6581_s5] ss:$8 sps:$4 sm:$0xff]   ;;  %v5149_v48 = vld [vmem:[#allocation4 + $0x254] ss:$24 sps:$4 sm:$0xff]  }
 0x18b   :  { %2208 = vmatpush1.bf16.msra.mxu1 %v5078_v50  ;;  %v5251_v50 = vld [vmem:[%s6581_s5 + $0x24] ss:$8 sps:$4 sm:$0xff]  }
 0x18c   :  { %2087 = vmatpush1.bf16.msra.mxu0 %v5045_v44  ;;  %2209 = vmatprep.subr.bf16.mxu1 %v5086_v51  ;;  %v5146_v44 = vld [vmem:[#allocation4 + $0x224] ss:$24 sps:$4 sm:$0xff]   ;;  %v5147_v51 = vld [vmem:[#allocation4 + $0x250] ss:$24 sps:$4 sm:$0xff]  }
 0x18d   :  { %2088 = vmatprep.subr.bf16.mxu0 %v5053_v45  ;;  %v5243_v45 = vld [vmem:[%s6581_s5 + $0x10] ss:$8 sps:$4 sm:$0xff]  }
 0x18f   :  { %2210 = vmatpush1.bf16.msra.mxu1 %v5084_v54  ;;  %v5257_v54 = vld [vmem:[%s6581_s5 + $0x34] ss:$8 sps:$4 sm:$0xff]  }
 0x190   :  { %2089 = vmatpush1.bf16.msra.mxu0 %v5051_v46  ;;  %2211 = vmatprep.subr.bf16.mxu1 %v5092_v55  ;;  %v5245_v46 = vld [vmem:[%s6581_s5 + $0x14] ss:$8 sps:$4 sm:$0xff]  }
 0x191   :  { %2090 = vmatprep.subr.bf16.mxu0 %v5059_v49  ;;  %v5249_v49 = vld [vmem:[%s6581_s5 + $0x20] ss:$8 sps:$4 sm:$0xff]   ;;  %v5150_v55 = vld [vmem:[#allocation4 + $0x280] ss:$24 sps:$4 sm:$0xff]  }
 0x193   :  { %2212 = vmatpush1.bf16.msra.mxu1 %v5090_v58  ;;  %v5263_v58 = vld [vmem:[%s6581_s5 + $0x44] ss:$8 sps:$4 sm:$0xff]  }
 0x194   :  { %2091 = vmatpush1.bf16.msra.mxu0 %v5057_v52  ;;  %2213 = vmatprep.subr.bf16.mxu1 %v5098_v59  ;;  %v5152_v52 = vld [vmem:[#allocation4 + $0x284] ss:$24 sps:$4 sm:$0xff]   ;;  %v5153_v59 = vld [vmem:[#allocation4 + $0x2b0] ss:$24 sps:$4 sm:$0xff]  }
 0x195   :  { %2092 = vmatprep.subr.bf16.mxu0 %v5065_v53  ;;  %v5255_v53 = vld [vmem:[%s6581_s5 + $0x30] ss:$8 sps:$4 sm:$0xff]  }
 0x197   :  { %2214 = vmatpush1.bf16.msra.mxu1 %v5096_v62  ;;  %v5269_v62 = vld [vmem:[%s6581_s5 + $0x54] ss:$8 sps:$4 sm:$0xff]  }
 0x198   :  { %2093 = vmatpush1.bf16.msra.mxu0 %v5063_v56  ;;  %2215 = vmatprep.subr.bf16.mxu1 %v5104_v63  ;;  %v5155_v56 = vld [vmem:[#allocation4 + $0x2b4] ss:$24 sps:$4 sm:$0xff]   ;;  %v5156_v63 = vld [vmem:[#allocation4 + $0x2e0] ss:$24 sps:$4 sm:$0xff]  }
 0x199   :  { %2094 = vmatprep.subr.bf16.mxu0 %v5071_v57  ;;  %v5261_v57 = vld [vmem:[%s6581_s5 + $0x40] ss:$8 sps:$4 sm:$0xff]  }
 0x19b   :  { %2216 = vmatpush1.bf16.msra.mxu1 %v5102_v3  ;;  %v5275_v3 = vld [vmem:[%s6581_s5 + $0x64] ss:$8 sps:$4 sm:$0xff]  }
 0x19c   :  { %2095 = vmatpush1.bf16.msra.mxu0 %v5069_v60  ;;  %2217 = vmatprep.subr.bf16.mxu1 %v5110_v4  ;;  %v5158_v60 = vld [vmem:[#allocation4 + $0x2e4] ss:$24 sps:$4 sm:$0xff]   ;;  %v5159_v4 = vld [vmem:[#allocation4 + $0x310] ss:$24 sps:$4 sm:$0xff]  }
 0x19d   :  { %2096 = vmatprep.subr.bf16.mxu0 %v5077_v61  ;;  %v5267_v61 = vld [vmem:[%s6581_s5 + $0x50] ss:$8 sps:$4 sm:$0xff]  }
 0x19f   :  { %2218 = vmatpush1.bf16.msra.mxu1 %v5108_v8  ;;  %v5276_v8 = vld [vmem:[%s6581_s5 + $0x70] ss:$8 sps:$4 sm:$0xff]  }
 0x1a0   :  { %2097 = vmatpush1.bf16.msra.mxu0 %v5075_v1  ;;  %2219 = vmatprep.subr.bf16.mxu1 %v5116_v9  ;;  %v5161_v1 = vld [vmem:[#allocation4 + $0x314] ss:$24 sps:$4 sm:$0xff]   ;;  %v5162_v9 = vld [vmem:[#allocation4 + $0x340] ss:$24 sps:$4 sm:$0xff]  }
 0x1a1   :  { %2098 = vmatprep.subr.bf16.mxu0 %v5083_v2  ;;  %v5273_v2 = vld [vmem:[%s6581_s5 + $0x60] ss:$8 sps:$4 sm:$0xff]  }
 0x1a3   :  { %2220 = vmatpush1.bf16.msra.mxu1 %v5114_v14  ;;  %v5165_v14 = vld [vmem:[#allocation4 + $0x370] ss:$24 sps:$4 sm:$0xff]  }
 0x1a4   :  { %2099 = vmatpush1.bf16.msra.mxu0 %v5081_v5  ;;  %2221 = vmatprep.subr.bf16.mxu1 %v5122_v15  ;;  %v5164_v5 = vld [vmem:[#allocation4 + $0x344] ss:$24 sps:$4 sm:$0xff]   ;;  %v5290_v15 = vld [vmem:[%s6581_s5 + $0x94] ss:$8 sps:$4 sm:$0xff]  }
 0x1a5   :  { %2100 = vmatprep.subr.bf16.mxu0 %v5089_v6  ;;  %v5278_v6 = vld [vmem:[%s6581_s5 + $0x74] ss:$8 sps:$4 sm:$0xff]  }
 0x1a7   :  { %2222 = vmatpush1.bf16.msra.mxu1 %v5120_v19  ;;  %v5296_v19 = vld [vmem:[%s6581_s5 + $0xa4] ss:$8 sps:$4 sm:$0xff]  }
 0x1a8   :  { %2101 = vmatpush1.bf16.msra.mxu0 %v5087_v11  ;;  %2223 = vmatprep.subr.bf16.mxu1 %v5128_v21  ;;  %v5167_v11 = vld [vmem:[#allocation4 + $0x374] ss:$24 sps:$4 sm:$0xff]   ;;  %v5294_v21 = vld [vmem:[%s6581_s5 + $0xa0] ss:$8 sps:$4 sm:$0xff]  }
 0x1a9   :  { %2234 = vmatprep.subr.bf16.mxu0 %v5095_v13  ;;  %v5282_v13 = vld [vmem:[%s6581_s5 + $0x80] ss:$8 sps:$4 sm:$0xff]  }
 0x1ab   :  { %2103 = vmatmul.mubr.bf16.vlgmr.msra.gmra.mrb[0].mxu0 %v6220_v17  ;;  %2224 = vmatpush1.bf16.msra.mxu1 %v5126_v24  ;;  %v5302_v24 = vld [vmem:[%s6581_s5 + $0xb4] ss:$8 sps:$4 sm:$0xff]  }
 0x1ac   :  { %2235 = vmatpush1.bf16.msra.mxu0 %v5093_v16  ;;  %2266 = vmatprep.mubr.bf16.mxu0 %v6185_v36  ;;  %v5123_v36 = vld [vmem:[#allocation4 + $0x100] ss:$24 sps:$4 sm:$0xff]  }
 0x1ad   :  { %2236 = vmatprep.subr.bf16.mxu0 %v5101_v18  ;;  %2957 = vmatprep.subr.bf16.mxu1 %v5239_v42  ;;  %v5168_v16 = vld [vmem:[#allocation4 + $0x3a0] ss:$24 sps:$4 sm:$0xff]   ;;  %v5173_v18 = vld [vmem:[#allocation4 + $0x3d4] ss:$24 sps:$4 sm:$0xff]  }
 0x1ae   :  { %2226 = vmatmul.mubr.bf16.vlgmr.msra.gmra.mrb[0].mxu1 %v6220_v17  ;;  %v5186_v42 = vld [vmem:[#allocation4 + $0x4c0] ss:$24 sps:$4 sm:$0xff]  }
 0x1af   :  { %2958 = vmatpush1.bf16.msra.mxu1 %v5237_v41  ;;  %v5324_v41 = vld [vmem:[%s6581_s5 + $0xf0] ss:$8 sps:$4 sm:$0xff]  }
 0x1b0   :  { %2237 = vmatpush1.bf16.msra.mxu0 %v5099_v22  ;;  %2959 = vmatprep.subr.bf16.mxu1 %v5245_v46  ;;  %v5171_v22 = vld [vmem:[#allocation4 + $0x3d0] ss:$24 sps:$4 sm:$0xff]   ;;  %v5194_v46 = vld [vmem:[#allocation4 + $0x524] ss:$24 sps:$4 sm:$0xff]  }
 0x1b1   :  { %2238 = vmatprep.subr.bf16.mxu0 %v5107_v23  ;;  %v5176_v23 = vld [vmem:[#allocation4 + $0x404] ss:$24 sps:$4 sm:$0xff]  }
 0x1b3   :  { %2960 = vmatpush1.bf16.msra.mxu1 %v5243_v45  ;;  %v5189_v45 = vld [vmem:[#allocation4 + $0x4f0] ss:$24 sps:$4 sm:$0xff]  }
 0x1b4   :  { %2239 = vmatpush1.bf16.msra.mxu0 %v5105_v25  ;;  %2961 = vmatprep.subr.bf16.mxu1 %v5251_v50  ;;  %v5300_v25 = vld [vmem:[%s6581_s5 + $0xb0] ss:$8 sps:$4 sm:$0xff]   ;;  %v5200_v50 = vld [vmem:[#allocation4 + $0x584] ss:$24 sps:$4 sm:$0xff]  }
 0x1b5   :  { %2240 = vmatprep.subr.bf16.mxu0 %v5113_v26  ;;  %v5174_v26 = vld [vmem:[#allocation4 + $0x400] ss:$24 sps:$4 sm:$0xff]  }
 0x1b7   :  { %2962 = vmatpush1.bf16.msra.mxu1 %v5249_v49  ;;  %v5195_v49 = vld [vmem:[#allocation4 + $0x550] ss:$24 sps:$4 sm:$0xff]  }
 0x1b8   :  { %2241 = vmatpush1.bf16.msra.mxu0 %v5111_v27  ;;  %2963 = vmatprep.subr.bf16.mxu1 %v5257_v54  ;;  %v5179_v27 = vld [vmem:[#allocation4 + $0x434] ss:$24 sps:$4 sm:$0xff]   ;;  %v5206_v54 = vld [vmem:[#allocation4 + $0x5e4] ss:$24 sps:$4 sm:$0xff]  }
 0x1b9   :  { %2242 = vmatprep.subr.bf16.mxu0 %v5119_v28  ;;  %v5308_v28 = vld [vmem:[%s6581_s5 + $0xc4] ss:$8 sps:$4 sm:$0xff]  }
 0x1bb   :  { %2964 = vmatpush1.bf16.msra.mxu1 %v5255_v53  ;;  %v5201_v53 = vld [vmem:[#allocation4 + $0x5b0] ss:$24 sps:$4 sm:$0xff]  }
 0x1bc   :  { %2243 = vmatpush1.bf16.msra.mxu0 %v5117_v29  ;;  %2965 = vmatprep.subr.bf16.mxu1 %v5263_v58  ;;  %v5177_v29 = vld [vmem:[#allocation4 + $0x430] ss:$24 sps:$4 sm:$0xff]   ;;  %v5212_v58 = vld [vmem:[#allocation4 + $0x644] ss:$24 sps:$4 sm:$0xff]  }
 0x1bd   :  { %2244 = vmatprep.subr.bf16.mxu0 %v5125_v30  ;;  %v5306_v30 = vld [vmem:[%s6581_s5 + $0xc0] ss:$8 sps:$4 sm:$0xff]  }
 0x1bf   :  { %2966 = vmatpush1.bf16.msra.mxu1 %v5261_v57  ;;  %v5207_v57 = vld [vmem:[#allocation4 + $0x610] ss:$24 sps:$4 sm:$0xff]  }
 0x1c0   :  { %2245 = vmatpush1.bf16.msra.mxu0 %v5123_v36  ;;  %2967 = vmatprep.subr.bf16.mxu1 %v5269_v62  ;;  %v5182_v36 = vld [vmem:[#allocation4 + $0x464] ss:$24 sps:$4 sm:$0xff]  }
 0x1c1   :  { %2246 = vmatprep.subr.bf16.mxu0 %v5131_v31  ;;  %v5314_v31 = vld [vmem:[%s6581_s5 + $0xd4] ss:$8 sps:$4 sm:$0xff]   ;;  %v5218_v62 = vld [vmem:[#allocation4 + $0x6a4] ss:$24 sps:$4 sm:$0xff]  }
 0x1c3   :  { %2968 = vmatpush1.bf16.msra.mxu1 %v5267_v61  ;;  %v5213_v61 = vld [vmem:[#allocation4 + $0x670] ss:$24 sps:$4 sm:$0xff]  }
 0x1c4   :  { %2247 = vmatpush1.bf16.msra.mxu0 %v5129_v32  ;;  %2969 = vmatprep.subr.bf16.mxu1 %v5275_v3  ;;  %v5180_v32 = vld [vmem:[#allocation4 + $0x460] ss:$24 sps:$4 sm:$0xff]   ;;  %v5224_v3 = vld [vmem:[#allocation4 + $0x704] ss:$24 sps:$4 sm:$0xff]  }
 0x1c5   :  { %2248 = vmatprep.subr.bf16.mxu0 %v5134_v33  ;;  %v5312_v33 = vld [vmem:[%s6581_s5 + $0xd0] ss:$8 sps:$4 sm:$0xff]  }
 0x1c7   :  { %2970 = vmatpush1.bf16.msra.mxu1 %v5273_v2  ;;  %v5219_v2 = vld [vmem:[#allocation4 + $0x6d0] ss:$24 sps:$4 sm:$0xff]  }
 0x1c8   :  { %2249 = vmatpush1.bf16.msra.mxu0 %v5132_v34  ;;  %2971 = vmatprep.subr.bf16.mxu1 %v5278_v6  ;;  %v5185_v34 = vld [vmem:[#allocation4 + $0x494] ss:$24 sps:$4 sm:$0xff]   ;;  %v5228_v6 = vld [vmem:[#allocation4 + $0x760] ss:$24 sps:$4 sm:$0xff]  }
 0x1c9   :  { %2250 = vmatprep.subr.bf16.mxu0 %v5137_v35  ;;  %v5320_v35 = vld [vmem:[%s6581_s5 + $0xe4] ss:$8 sps:$4 sm:$0xff]  }
 0x1cb   :  { %2972 = vmatpush1.bf16.msra.mxu1 %v5276_v8  ;;  %v5233_v8 = vld [vmem:[#allocation4 + $0x794] ss:$24 sps:$4 sm:$0xff]  }
 0x1cc   :  { %2251 = vmatpush1.bf16.msra.mxu0 %v5135_v37  ;;  %2973 = vmatprep.subr.bf16.mxu1 %v5284_v12  ;;  %v5318_v37 = vld [vmem:[%s6581_s5 + $0xe0] ss:$8 sps:$4 sm:$0xff]   ;;  %v5234_v12 = vld [vmem:[#allocation4 + $0x7c0] ss:$24 sps:$4 sm:$0xff]  }
 0x1cd   :  { %2252 = vmatprep.subr.bf16.mxu0 %v5140_v38  ;;  %v5183_v38 = vld [vmem:[#allocation4 + $0x490] ss:$24 sps:$4 sm:$0xff]  }
 0x1cf   :  { %2974 = vmatpush1.bf16.msra.mxu1 %v5282_v13  ;;  %v5242_v13 = vld [vmem:[#allocation4 + $0x7f4] ss:$24 sps:$4 sm:$0xff]  }
 0x1d0   :  { %2253 = vmatpush1.bf16.msra.mxu0 %v5138_v39  ;;  %2975 = vmatprep.subr.bf16.mxu1 %v5290_v15  ;;  %v5188_v39 = vld [vmem:[#allocation4 + $0x4c4] ss:$24 sps:$4 sm:$0xff]   ;;  %v5246_v15 = vld [vmem:[#allocation4 + $0x820] ss:$24 sps:$4 sm:$0xff]  }
 0x1d1   :  { %2254 = vmatprep.subr.bf16.mxu0 %v5143_v40  ;;  %v5326_v40 = vld [vmem:[%s6581_s5 + $0xf4] ss:$8 sps:$4 sm:$0xff]  }
 0x1d4   :  { %2255 = vmatpush1.bf16.msra.mxu0 %v5141_v43  ;;  %v5191_v43 = vld [vmem:[#allocation4 + $0x4f4] ss:$24 sps:$4 sm:$0xff]  }
 0x1d5   :  { %2256 = vmatprep.subr.bf16.mxu0 %v5146_v44  ;;  %v5329_v44 = vld [vmem:[%s6581_s5 + $0x104] ss:$8 sps:$4 sm:$0xff]  }
 0x1d8   :  { %2257 = vmatpush1.bf16.msra.mxu0 %v5144_v47  ;;  %v5192_v47 = vld [vmem:[#allocation4 + $0x520] ss:$24 sps:$4 sm:$0xff]  }
 0x1d9   :  { %2258 = vmatprep.subr.bf16.mxu0 %v5149_v48  ;;  %v5197_v48 = vld [vmem:[#allocation4 + $0x554] ss:$24 sps:$4 sm:$0xff]  }
 0x1dc   :  { %2259 = vmatpush1.bf16.msra.mxu0 %v5147_v51  ;;  %v5198_v51 = vld [vmem:[#allocation4 + $0x580] ss:$24 sps:$4 sm:$0xff]  }
 0x1dd   :  { %2260 = vmatprep.subr.bf16.mxu0 %v5152_v52  ;;  %v5203_v52 = vld [vmem:[#allocation4 + $0x5b4] ss:$24 sps:$4 sm:$0xff]  }
 0x1e0   :  { %2261 = vmatpush1.bf16.msra.mxu0 %v5150_v55  ;;  %v5204_v55 = vld [vmem:[#allocation4 + $0x5e0] ss:$24 sps:$4 sm:$0xff]  }
 0x1e1   :  { %2262 = vmatprep.subr.bf16.mxu0 %v5155_v56  ;;  %v5209_v56 = vld [vmem:[#allocation4 + $0x614] ss:$24 sps:$4 sm:$0xff]  }
 0x1e4   :  { %2263 = vmatpush1.bf16.msra.mxu0 %v5153_v59  ;;  %v5210_v59 = vld [vmem:[#allocation4 + $0x640] ss:$24 sps:$4 sm:$0xff]  }
 0x1e5   :  { %2264 = vmatprep.subr.bf16.mxu0 %v5158_v60  ;;  %v5215_v60 = vld [vmem:[#allocation4 + $0x674] ss:$24 sps:$4 sm:$0xff]  }
 0x1e8   :  { %2265 = vmatpush1.bf16.msra.mxu0 %v5156_v63  ;;  %v5216_v63 = vld [vmem:[#allocation4 + $0x6a0] ss:$24 sps:$4 sm:$0xff]  }
 0x1e9   :  { %2275 = vmatprep.subr.bf16.mxu0 %v5161_v1  ;;  %v5221_v1 = vld [vmem:[#allocation4 + $0x6d4] ss:$24 sps:$4 sm:$0xff]  }
 0x1eb   :  { %2267 = vmatmul.mubr.bf16.vlgmr.msra.gmra.mrb[4].mxu0 %v6192_v0  ;;  %v5170_v0 = vld [vmem:[#allocation4 + $0x3a4] ss:$24 sps:$4 sm:$0xff]  }
 0x1ec   :  { %2276 = vmatpush1.bf16.msra.mxu0 %v5159_v4  ;;  %2307 = vmatprep.mubr.bf16.mxu0 %v6199_v20  ;;  %v5288_v20 = vld [vmem:[%s6581_s5 + $0x90] ss:$8 sps:$4 sm:$0xff]  }
 0x1ed   :  { %2277 = vmatprep.subr.bf16.mxu0 %v5164_v5  ;;  %2976 = vmatpush1.bf16.msra.mxu1 %v5288_v20  ;;  %v5227_v4 = vld [vmem:[#allocation4 + $0x734] ss:$24 sps:$4 sm:$0xff]   ;;  %v5230_v5 = vld [vmem:[#allocation4 + $0x764] ss:$24 sps:$4 sm:$0xff]  }
 0x1ee   :  { %2977 = vmatprep.subr.bf16.mxu1 %v5296_v19  ;;  %v5254_v20 = vld [vmem:[#allocation4 + $0x854] ss:$24 sps:$4 sm:$0xff]   ;;  %v5258_v19 = vld [vmem:[#allocation4 + $0x880] ss:$24 sps:$4 sm:$0xff]  }
 0x1f0   :  { %2278 = vmatpush1.bf16.msra.mxu0 %v5162_v9  ;;  %v5231_v9 = vld [vmem:[#allocation4 + $0x790] ss:$24 sps:$4 sm:$0xff]  }
 0x1f1   :  { %2279 = vmatprep.subr.bf16.mxu0 %v5167_v11  ;;  %2978 = vmatpush1.bf16.msra.mxu1 %v5294_v21  ;;  %v5236_v11 = vld [vmem:[#allocation4 + $0x7c4] ss:$24 sps:$4 sm:$0xff]   ;;  %v5266_v21 = vld [vmem:[#allocation4 + $0x8b4] ss:$24 sps:$4 sm:$0xff]  }
 0x1f2   :  { %2979 = vmatprep.subr.bf16.mxu1 %v5302_v24  ;;  %v5270_v24 = vld [vmem:[#allocation4 + $0x8e0] ss:$24 sps:$4 sm:$0xff]  }
 0x1f4   :  { %2280 = vmatpush1.bf16.msra.mxu0 %v5165_v14  ;;  %v5240_v14 = vld [vmem:[#allocation4 + $0x7f0] ss:$24 sps:$4 sm:$0xff]  }
 0x1f5   :  { %2281 = vmatprep.subr.bf16.mxu0 %v5170_v0  ;;  %2980 = vmatpush1.bf16.msra.mxu1 %v5300_v25  ;;  %v5248_v0 = vld [vmem:[#allocation4 + $0x824] ss:$24 sps:$4 sm:$0xff]   ;;  %v5281_v25 = vld [vmem:[#allocation9 + $0x4] ss:$8 sps:$4 sm:$0xff]  }
 0x1f6   :  { %2981 = vmatprep.subr.bf16.mxu1 %v5308_v28  ;;  %v5285_v28 = vld [vmem:[#allocation9 + $0x10] ss:$8 sps:$4 sm:$0xff]  }
 0x1f8   :  { %2282 = vmatpush1.bf16.msra.mxu0 %v5168_v16  ;;  %v5252_v16 = vld [vmem:[#allocation4 + $0x850] ss:$24 sps:$4 sm:$0xff]  }
 0x1f9   :  { %2283 = vmatprep.subr.bf16.mxu0 %v5173_v18  ;;  %2982 = vmatpush1.bf16.msra.mxu1 %v5306_v30  ;;  %v5260_v18 = vld [vmem:[#allocation4 + $0x884] ss:$24 sps:$4 sm:$0xff]   ;;  %v5293_v30 = vld [vmem:[#allocation9 + $0x24] ss:$8 sps:$4 sm:$0xff]  }
 0x1fa   :  { %2983 = vmatprep.subr.bf16.mxu1 %v5314_v31  ;;  %v5291_v31 = vld [vmem:[#allocation9 + $0x20] ss:$8 sps:$4 sm:$0xff]  }
 0x1fc   :  { %2284 = vmatpush1.bf16.msra.mxu0 %v5171_v22  ;;  %v5264_v22 = vld [vmem:[#allocation4 + $0x8b0] ss:$24 sps:$4 sm:$0xff]  }
 0x1fd   :  { %2285 = vmatprep.subr.bf16.mxu0 %v5176_v23  ;;  %2984 = vmatpush1.bf16.msra.mxu1 %v5312_v33  ;;  %v5272_v23 = vld [vmem:[#allocation4 + $0x8e4] ss:$24 sps:$4 sm:$0xff]  }
 0x1fe   :  { %2985 = vmatprep.subr.bf16.mxu1 %v5320_v35  ;;  %v5305_v35 = vld [vmem:[#allocation9 + $0x44] ss:$8 sps:$4 sm:$0xff]  }
 0x200   :  { %2286 = vmatpush1.bf16.msra.mxu0 %v5174_v26  ;;  %v5279_v26 = vld [vmem:[#allocation9] ss:$8 sps:$4 sm:$0xff]  }
 0x201   :  { %2287 = vmatprep.subr.bf16.mxu0 %v5179_v27  ;;  %2986 = vmatpush1.bf16.msra.mxu1 %v5318_v37  ;;  %v5287_v27 = vld [vmem:[#allocation9 + $0x14] ss:$8 sps:$4 sm:$0xff]   ;;  %v5303_v37 = vld [vmem:[#allocation9 + $0x40] ss:$8 sps:$4 sm:$0xff]  }
 0x202   :  { %2987 = vmatprep.subr.bf16.mxu1 %v5326_v40  ;;  %v5311_v40 = vld [vmem:[#allocation9 + $0x54] ss:$8 sps:$4 sm:$0xff]  }
 0x204   :  { %2288 = vmatpush1.bf16.msra.mxu0 %v5177_v29  ;;  %v5914_v29 = vmov 0  }
 0x205   :  { %2289 = vmatprep.subr.bf16.mxu0 %v5182_v36  ;;  %2988 = vmatpush1.bf16.msra.mxu1 %v5324_v41  ;;  %v518_v36 = vlaneseq }
 0x206   :  { %2998 = vmatprep.subr.bf16.mxu1 %v5329_v44  ;;  %v5317_v44 = vld [vmem:[#allocation9 + $0x64] ss:$8 sps:$4 sm:$0xff]  }
 0x207   :  { %v6330_v33 = vshrl.u32 %v518_v36, 7 }
 0x208   :  { %2290 = vmatpush1.bf16.msra.mxu0 %v5180_v32  ;;  %v5299_v32 = vld [vmem:[#allocation9 + $0x34] ss:$8 sps:$4 sm:$0xff]  }
 0x209   :  { %2291 = vmatprep.subr.bf16.mxu0 %v5185_v34  ;;  %v5297_v34 = vld [vmem:[#allocation9 + $0x30] ss:$8 sps:$4 sm:$0xff]   ;;  %v528_v36 = vsub.s32 2, %v6330_v33 }
 0x20c   :  { %2292 = vmatpush1.bf16.msra.mxu0 %v5183_v38  ;;  %v6335_v38 = vld [vmem:[#allocation6] sm:$0x3f] }
 0x20d   :  { %2293 = vmatprep.subr.bf16.mxu0 %v5188_v39  ;;  %v6338_v39 = vsub.s32 1, %v6330_v33 }
 0x210   :  { %2294 = vmatpush1.bf16.msra.mxu0 %v5186_v42  ;;  %v525_v42 = vrot.slane %v6335_v38, %v6338_v39 }
 0x211   :  { %2295 = vmatprep.subr.bf16.mxu0 %v5191_v43  ;;  %v5309_v43 = vld [vmem:[#allocation9 + $0x50] ss:$8 sps:$4 sm:$0xff]  }
 0x214   :  { %2296 = vmatpush1.bf16.msra.mxu0 %v5189_v45 }
 0x215   :  { %2297 = vmatprep.subr.bf16.mxu0 %v5194_v46 }
 0x218   :  { %2298 = vmatpush1.bf16.msra.mxu0 %v5192_v47 }
 0x219   :  { %2299 = vmatprep.subr.bf16.mxu0 %v5197_v48 }
 0x21c   :  { %2300 = vmatpush1.bf16.msra.mxu0 %v5195_v49 }
 0x21d   :  { %2301 = vmatprep.subr.bf16.mxu0 %v5200_v50  ;;  %v5315_v50 = vld [vmem:[#allocation9 + $0x60] ss:$8 sps:$4 sm:$0xff]  }
 0x220   :  { %2302 = vmatpush1.bf16.msra.mxu0 %v5198_v51 }
 0x221   :  { %2303 = vmatprep.subr.bf16.mxu0 %v5203_v52  ;;  %v5323_v52 = vld [vmem:[#allocation9 + $0x74] ss:$8 sps:$4 sm:$0xff]  }
 0x224   :  { %2304 = vmatpush1.bf16.msra.mxu0 %v5201_v53  ;;  %v532_v53 = vsub.s32 3, %v6330_v33 }
 0x225   :  { %2305 = vmatprep.subr.bf16.mxu0 %v5206_v54  ;;  %v5321_v54 = vld [vmem:[#allocation9 + $0x70] ss:$8 sps:$4 sm:$0xff]  }
 0x228   :  { %2306 = vmatpush1.bf16.msra.mxu0 %v5204_v55  ;;  %v3080_v55 = vld [vmem:[%s6577_s1] sm:$0xff] }
 0x229   :  { %2316 = vmatprep.subr.bf16.mxu0 %v5209_v56  ;;  %v3081_v56 = vld [vmem:[%s6577_s1 + $0x8] sm:$0xff] }
 0x22b   :  { %2308 = vmatmul.mubr.bf16.vlgmr.msra.gmra.mrb[4].mxu0 %v6209_v7  ;;  %v5222_v7 = vld [vmem:[#allocation4 + $0x700] ss:$24 sps:$4 sm:$0xff]  }
 0x22c   :  { %2317 = vmatpush1.bf16.msra.mxu0 %v5207_v57  ;;  %2348 = vmatprep.mubr.bf16.mxu0 %v6211_v10  ;;  %v5225_v10 = vld [vmem:[#allocation4 + $0x730] ss:$24 sps:$4 sm:$0xff]   ;;  %v533_v57 = vrot.slane %v6335_v38, %v532_v53  ;;  %v5378_v53 = vld [vmem:[%s6581_s5 + $0x210] ss:$8 sps:$4 sm:$0xff]  }
 0x22d   :  { %2318 = vmatprep.subr.bf16.mxu0 %v5212_v58  ;;  %v3084_v58 = vpack.c.bf16 %v3081_v56, %v3080_v55  ;;  %v5381_v55 = vld [vmem:[%s6581_s5 + $0x220] ss:$8 sps:$4 sm:$0xff]   ;;  %v5386_v56 = vld [vmem:[%s6581_s5 + $0x234] ss:$8 sps:$4 sm:$0xff]  }
 0x230   :  { %2319 = vmatpush1.bf16.msra.mxu0 %v5210_v59 }
 0x231   :  { %2320 = vmatprep.subr.bf16.mxu0 %v5215_v60 }
 0x234   :  { %2321 = vmatpush1.bf16.msra.mxu0 %v5213_v61 }
 0x235   :  { %2322 = vmatprep.subr.bf16.mxu0 %v5218_v62 }
 0x238   :  { %2323 = vmatpush1.bf16.msra.mxu0 %v5216_v63 }
 0x239   :  { %2324 = vmatprep.subr.bf16.mxu0 %v5221_v1 }
 0x23c   :  { %2325 = vmatpush1.bf16.msra.mxu0 %v5219_v2 }
 0x23d   :  { %2326 = vmatprep.subr.bf16.mxu0 %v5224_v3  ;;  %v3082_v3 = vld [vmem:[%s6577_s1 + $0x10] sm:$0xff] }
 0x240   :  { %2327 = vmatpush1.bf16.msra.mxu0 %v5222_v7  ;;  %v3083_v7 = vld [vmem:[%s6577_s1 + $0x18] sm:$0xff] }
 0x241   :  { %2328 = vmatprep.subr.bf16.mxu0 %v5227_v4 }
 0x244   :  { %2329 = vmatpush1.bf16.msra.mxu0 %v5225_v10  ;;  %v5327_v10 = vld [vmem:[%s6581_s5 + $0x100] ss:$8 sps:$4 sm:$0xff]  }
 0x245   :  { %2330 = vmatprep.subr.bf16.mxu0 %v5230_v5 }
 0x248   :  { %2331 = vmatpush1.bf16.msra.mxu0 %v5228_v6  ;;  %v5332_v6 = vld [vmem:[%s6581_s5 + $0x114] ss:$8 sps:$4 sm:$0xff]  }
 0x249   :  { %2332 = vmatprep.subr.bf16.mxu0 %v5233_v8  ;;  %v3085_v8 = vpack.c.bf16 %v3083_v7, %v3082_v3  ;;  %v5401_v3 = vld [vmem:[%s6581_s5 + $0x284] ss:$8 sps:$4 sm:$0xff]   ;;  %v5399_v7 = vld [vmem:[%s6581_s5 + $0x280] ss:$8 sps:$4 sm:$0xff]  }
 0x24c   :  { %2333 = vmatpush1.bf16.msra.mxu0 %v5231_v9  ;;  %v5330_v9 = vld [vmem:[%s6581_s5 + $0x110] ss:$8 sps:$4 sm:$0xff]  }
 0x24d   :  { %2334 = vmatprep.subr.bf16.mxu0 %v5236_v11  ;;  %v5335_v11 = vld [vmem:[%s6581_s5 + $0x124] ss:$8 sps:$4 sm:$0xff]  }
 0x250   :  { %2335 = vmatpush1.bf16.msra.mxu0 %v5234_v12  ;;  %v5333_v12 = vld [vmem:[%s6581_s5 + $0x120] ss:$8 sps:$4 sm:$0xff]  }
 0x251   :  { %2336 = vmatprep.subr.bf16.mxu0 %v5242_v13 }
 0x254   :  { %2337 = vmatpush1.bf16.msra.mxu0 %v5240_v14  ;;  %v5338_v14 = vld [vmem:[%s6581_s5 + $0x134] ss:$8 sps:$4 sm:$0xff]  }
 0x255   :  { %2338 = vmatprep.subr.bf16.mxu0 %v5248_v0 }
 0x258   :  { %2339 = vmatpush1.bf16.msra.mxu0 %v5246_v15  ;;  %v5336_v15 = vld [vmem:[%s6581_s5 + $0x130] ss:$8 sps:$4 sm:$0xff]  }
 0x259   :  { %2340 = vmatprep.subr.bf16.mxu0 %v5254_v20  ;;  %v5341_v20 = vld [vmem:[%s6581_s5 + $0x144] ss:$8 sps:$4 sm:$0xff]  }
 0x25c   :  { %2341 = vmatpush1.bf16.msra.mxu0 %v5252_v16  ;;  %v5339_v16 = vld [vmem:[%s6581_s5 + $0x140] ss:$8 sps:$4 sm:$0xff]  }
 0x25d   :  { %2342 = vmatprep.subr.bf16.mxu0 %v5260_v18  ;;  %v5344_v18 = vld [vmem:[%s6581_s5 + $0x154] ss:$8 sps:$4 sm:$0xff]  }
 0x260   :  { %2343 = vmatpush1.bf16.msra.mxu0 %v5258_v19  ;;  %v5342_v19 = vld [vmem:[%s6581_s5 + $0x150] ss:$8 sps:$4 sm:$0xff]  }
 0x261   :  { %2344 = vmatprep.subr.bf16.mxu0 %v5266_v21  ;;  %v5347_v21 = vld [vmem:[%s6581_s5 + $0x164] ss:$8 sps:$4 sm:$0xff]  }
 0x264   :  { %2345 = vmatpush1.bf16.msra.mxu0 %v5264_v22  ;;  %v5345_v22 = vld [vmem:[%s6581_s5 + $0x160] ss:$8 sps:$4 sm:$0xff]  }
 0x265   :  { %2346 = vmatprep.subr.bf16.mxu0 %v5272_v23  ;;  %v5350_v23 = vld [vmem:[%s6581_s5 + $0x174] ss:$8 sps:$4 sm:$0xff]  }
 0x268   :  { %2347 = vmatpush1.bf16.msra.mxu0 %v5270_v24  ;;  %v5348_v24 = vld [vmem:[%s6581_s5 + $0x170] ss:$8 sps:$4 sm:$0xff]  }
 0x269   :  { %3194 = vmatprep.subr.bf16.mxu0 %v5281_v25  ;;  %v5353_v25 = vld [vmem:[%s6581_s5 + $0x184] ss:$8 sps:$4 sm:$0xff]  }
 0x26b   :  { %2349 = vmatmul.mubr.bf16.vlgmr.msra.gmra.mrb[4].mxu0 %v6220_v17  ;;  %v6333_v17 = vsub.s32 0, %v6330_v33 }
 0x26c   :  { %3195 = vmatpush1.bf16.msra.mxu0 %v5279_v26  ;;  %3226 = vmatprep.mubr.bf16.mxu0 %v5914_v29  ;;  %v5351_v26 = vld [vmem:[%s6581_s5 + $0x180] ss:$8 sps:$4 sm:$0xff]  }
 0x26d   :  { %3196 = vmatprep.subr.bf16.mxu0 %v5287_v27  ;;  %v521_v41 = vrot.slane %v6335_v38, %v6333_v17  ;;  %v5356_v27 = vld [vmem:[%s6581_s5 + $0x194] ss:$8 sps:$4 sm:$0xff]  }
 0x270   :  { %3197 = vmatpush1.bf16.msra.mxu0 %v5285_v28  ;;  %v5354_v28 = vld [vmem:[%s6581_s5 + $0x190] ss:$8 sps:$4 sm:$0xff]  }
 0x271   :  { %3198 = vmatprep.subr.bf16.mxu0 %v5293_v30  ;;  %v5359_v30 = vld [vmem:[%s6581_s5 + $0x1a4] ss:$8 sps:$4 sm:$0xff]  }
 0x274   :  { %3199 = vmatpush1.bf16.msra.mxu0 %v5291_v31  ;;  %v5357_v31 = vld [vmem:[%s6581_s5 + $0x1a0] ss:$8 sps:$4 sm:$0xff]  }
 0x275   :  { %3200 = vmatprep.subr.bf16.mxu0 %v5299_v32  ;;  %v5362_v32 = vld [vmem:[%s6581_s5 + $0x1b4] ss:$8 sps:$4 sm:$0xff]  }
 0x278   :  { %3201 = vmatpush1.bf16.msra.mxu0 %v5297_v34  ;;  %v529_v34 = vrot.slane %v6335_v38, %v528_v36 }
 0x279   :  { %3202 = vmatprep.subr.bf16.mxu0 %v5305_v35  ;;  %v5360_v35 = vld [vmem:[%s6581_s5 + $0x1b0] ss:$8 sps:$4 sm:$0xff]  }
 0x27c   :  { %3203 = vmatpush1.bf16.msra.mxu0 %v5303_v37  ;;  %v5365_v37 = vld [vmem:[%s6581_s5 + $0x1c4] ss:$8 sps:$4 sm:$0xff]  }
 0x27d   :  { %3204 = vmatprep.subr.bf16.mxu0 %v5311_v40 }
 0x27e   :  { %v2104_v45 = vpop.f32.mrb[0].mxu0 }
 0x27f   :  { %v4763_v46 = vadd.f32 %v2104_v45, %v521_v41  ;;  %v2106_v47 = vpop.f32.mrb[1].mxu0  ;;  %v5363_v41 = vld [vmem:[%s6581_s5 + $0x1c0] ss:$8 sps:$4 sm:$0xff]  }
 0x280   :  { %v4764_v48 = vadd.f32 %v2106_v47, %v525_v42  ;;  %v2108_v49 = vpop.f32.mrb[2].mxu0  ;;  %3205 = vmatpush1.bf16.msra.mxu0 %v5309_v43  ;;  %v5368_v42 = vld [vmem:[%s6581_s5 + $0x1d4] ss:$8 sps:$4 sm:$0xff]   ;;  %v5366_v43 = vld [vmem:[%s6581_s5 + $0x1d0] ss:$8 sps:$4 sm:$0xff]  }
 0x281   :  { %5583 = vtanh.f32 %v4763_v46  ;;  %v2109_v51 = vpop.f32.mrb[3].mxu0  ;;  %3206 = vmatprep.subr.bf16.mxu0 %v5317_v44  ;;  %v6352_v59 = vpop.f32.mrb[0].mxu1  ;;  %v5371_v44 = vld [vmem:[%s6581_s5 + $0x1e4] ss:$8 sps:$4 sm:$0xff]   ;;  %v5369_v45 = vld [vmem:[%s6581_s5 + $0x1e0] ss:$8 sps:$4 sm:$0xff]  }
 0x282   :  { %5585 = vtanh.f32 %v4764_v48  ;;  %v2229_v60 = vpop.f32.mrb[1].mxu1  ;;  %v4765_v40 = vadd.f32 %v6352_v59, %v529_v34  ;;  %v5374_v46 = vld [vmem:[%s6581_s5 + $0x1f4] ss:$8 sps:$4 sm:$0xff]   ;;  %v5372_v47 = vld [vmem:[%s6581_s5 + $0x1f0] ss:$8 sps:$4 sm:$0xff]  }
 0x283   :  { %v4766_v61 = vadd.f32 %v2229_v60, %v533_v57  ;;  %v2231_v62 = vpop.f32.mrb[2].mxu1  ;;  %v5377_v48 = vld [vmem:[%s6581_s5 + $0x204] ss:$8 sps:$4 sm:$0xff]   ;;  %v5384_v57 = vld [vmem:[%s6581_s5 + $0x230] ss:$8 sps:$4 sm:$0xff]  }
 0x284   :  { %3207 = vmatpush1.bf16.msra.mxu0 %v5315_v50  ;;  %v2232_v1 = vpop.f32.mrb[3].mxu1  ;;  %v5375_v50 = vld [vmem:[%s6581_s5 + $0x200] ss:$8 sps:$4 sm:$0xff]   ;;  %v5392_v60 = vld [vmem:[%s6581_s5 + $0x254] ss:$8 sps:$4 sm:$0xff]  }
 0x285   :  { %3208 = vmatprep.subr.bf16.mxu0 %v5323_v52  ;;  %5587 = vtanh.f32 %v4766_v61  ;;  %v5380_v52 = vld [vmem:[%s6581_s5 + $0x214] ss:$8 sps:$4 sm:$0xff]   ;;  %v5387_v59 = vld [vmem:[%s6581_s5 + $0x240] ss:$8 sps:$4 sm:$0xff]   ;;  %v5390_v61 = vld [vmem:[%s6581_s5 + $0x250] ss:$8 sps:$4 sm:$0xff]  }
 0x286   :  { %5589 = vtanh.f32 %v4765_v40  ;;  %v5395_v62 = vld [vmem:[%s6581_s5 + $0x264] ss:$8 sps:$4 sm:$0xff]   ;;  %v5398_v1 = vld [vmem:[%s6581_s5 + $0x274] ss:$8 sps:$4 sm:$0xff]  }
 0x288   :  { %3209 = vmatpush1.bf16.msra.mxu0 %v5321_v54  ;;  %v5383_v54 = vld [vmem:[%s6581_s5 + $0x224] ss:$8 sps:$4 sm:$0xff]  }
 0x28b   :  { %v5584_v63 = vpop.eup %5583  ;;  %3227 = vmatmul.mubr.bf16.vlgmr.msra.gmra.mrb[8].mxu0 %v3084_v58  ;;  %v5389_v58 = vld [vmem:[%s6581_s5 + $0x244] ss:$8 sps:$4 sm:$0xff]  }
 0x28c   :  { %v5586_v2 = vpop.eup %5585  ;;  %3236 = vmatprep.mubr.bf16.mxu0 %v5914_v29  ;;  %v2363_v5 = vpack.c.bf16 %v5584_v63, %v5584_v63  ;;  %v5393_v63 = vld [vmem:[%s6581_s5 + $0x260] ss:$8 sps:$4 sm:$0xff]  }
 0x28d   :  { %v2364_v4 = vpack.c.bf16 %v5586_v2, %v5586_v2  ;;  %v5396_v2 = vld [vmem:[%s6581_s5 + $0x270] ss:$8 sps:$4 sm:$0xff]  }
 0x28f   :  { %2989 = vmatprep.mubr.bf16.mxu1 %v2364_v4  ;;  %v5588_v13 = vpop.eup %5587  ;;  %v5404_v4 = vld [vmem:[%s6581_s5 + $0x294] ss:$8 sps:$4 sm:$0xff]  }
 0x290   :  { %2990 = vmatmul.mubr.bf16.vlgmr.msra.gmra.mrb[4].mxu1 %v2363_v5  ;;  %v2366_v0 = vpack.c.bf16 %v5588_v13, %v5588_v13  ;;  %v5590_v49 = vpop.eup %5589  ;;  %v5407_v5 = vld [vmem:[%s6581_s5 + $0x2a4] ss:$8 sps:$4 sm:$0xff]   ;;  %v5416_v13 = vld [vmem:[%s6581_s5 + $0x2d4] ss:$8 sps:$4 sm:$0xff]  }
 0x291   :  { %2999 = vmatpush1.bf16.msra.mxu1 %v5327_v10  ;;  %v2365_v51 = vpack.c.bf16 %v5590_v49, %v5590_v49  ;;  %v5402_v10 = vld [vmem:[%s6581_s5 + $0x290] ss:$8 sps:$4 sm:$0xff]  }
 0x292   :  { %3000 = vmatprep.subr.bf16.mxu1 %v5332_v6  ;;  %3030 = vmatprep.mubr.bf16.mxu1 %v2366_v0  ;;  %v5405_v6 = vld [vmem:[%s6581_s5 + $0x2a0] ss:$8 sps:$4 sm:$0xff]   ;;  %v5419_v0 = vld [vmem:[%s6581_s5 + $0x2e4] ss:$8 sps:$4 sm:$0xff]  }
 0x293   :  { %3237 = vmatmul.mubr.bf16.gmra.mrb[12].mxu0 %v3085_v8  ;;  %v5410_v8 = vld [vmem:[%s6581_s5 + $0x2b4] ss:$8 sps:$4 sm:$0xff]  }
 0x295   :  { %3001 = vmatpush1.bf16.msra.mxu1 %v5330_v9  ;;  %v5408_v9 = vld [vmem:[%s6581_s5 + $0x2b0] ss:$8 sps:$4 sm:$0xff]  }
 0x296   :  { %3002 = vmatprep.subr.bf16.mxu1 %v5335_v11  ;;  %v5413_v11 = vld [vmem:[%s6581_s5 + $0x2c4] ss:$8 sps:$4 sm:$0xff]  }
 0x299   :  { %3003 = vmatpush1.bf16.msra.mxu1 %v5333_v12  ;;  %v5411_v12 = vld [vmem:[%s6581_s5 + $0x2c0] ss:$8 sps:$4 sm:$0xff]  }
 0x29a   :  { %3004 = vmatprep.subr.bf16.mxu1 %v5338_v14  ;;  %v5414_v14 = vld [vmem:[%s6581_s5 + $0x2d0] ss:$8 sps:$4 sm:$0xff]  }
 0x29d   :  { %3005 = vmatpush1.bf16.msra.mxu1 %v5336_v15  ;;  %v5417_v15 = vld [vmem:[%s6581_s5 + $0x2e0] ss:$8 sps:$4 sm:$0xff]  }
 0x29e   :  { %3006 = vmatprep.subr.bf16.mxu1 %v5341_v20  ;;  %v5422_v20 = vld [vmem:[%s6581_s5 + $0x2f4] ss:$8 sps:$4 sm:$0xff]  }
 0x2a1   :  { %3007 = vmatpush1.bf16.msra.mxu1 %v5339_v16  ;;  %v5420_v16 = vld [vmem:[%s6581_s5 + $0x2f0] ss:$8 sps:$4 sm:$0xff]  }
 0x2a2   :  { %3008 = vmatprep.subr.bf16.mxu1 %v5344_v18  ;;  %v536_v18 = vsub.s32 4, %v6330_v33 }
 0x2a5   :  { %3009 = vmatpush1.bf16.msra.mxu1 %v5342_v19  ;;  %v540_v19 = vsub.s32 5, %v6330_v33  ;;  %v3102_v33 = vld [vmem:[#allocation10] sm:$0x3] }
 0x2a6   :  { %3010 = vmatprep.subr.bf16.mxu1 %v5347_v21  ;;  %v537_v21 = vrot.slane %v6335_v38, %v536_v18  ;;  %v3107_v34 = vrot.slane %v3102_v33, %v6333_v17  ;;  %v5449_v18 = vld [vmem:[#allocation12 + $0x84] ss:$8 sps:$4 sm:$0xff]  }
 0x2a9   :  { %3011 = vmatpush1.bf16.msra.mxu1 %v5345_v22  ;;  %v541_v22 = vrot.slane %v6335_v38, %v540_v19  ;;  %v3111_v38 = vrot.slane %v3102_v33, %v6338_v39  ;;  %v5447_v19 = vld [vmem:[#allocation12 + $0x80] ss:$8 sps:$4 sm:$0xff]   ;;  %v5470_v33 = vld [vmem:[#allocation12 + $0xf4] ss:$8 sps:$4 sm:$0xff]  }
 0x2aa   :  { %3012 = vmatprep.subr.bf16.mxu1 %v5350_v23 }
 0x2ad   :  { %3013 = vmatpush1.bf16.msra.mxu1 %v5348_v24 }
 0x2ae   :  { %3014 = vmatprep.subr.bf16.mxu1 %v5353_v25 }
 0x2b1   :  { %3015 = vmatpush1.bf16.msra.mxu1 %v5351_v26 }
 0x2b2   :  { %3016 = vmatprep.subr.bf16.mxu1 %v5356_v27 }
 0x2b5   :  { %3017 = vmatpush1.bf16.msra.mxu1 %v5354_v28 }
 0x2b6   :  { %3018 = vmatprep.subr.bf16.mxu1 %v5359_v30 }
 0x2b9   :  { %3019 = vmatpush1.bf16.msra.mxu1 %v5357_v31 }
 0x2ba   :  { %3020 = vmatprep.subr.bf16.mxu1 %v5362_v32 }
 0x2bd   :  { %3021 = vmatpush1.bf16.msra.mxu1 %v5360_v35 }
 0x2be   :  { %3022 = vmatprep.subr.bf16.mxu1 %v5365_v37 }
 0x2c1   :  { %3023 = vmatpush1.bf16.msra.mxu1 %v5363_v41 }
 0x2c2   :  { %3024 = vmatprep.subr.bf16.mxu1 %v5368_v42 }
 0x2c5   :  { %3025 = vmatpush1.bf16.msra.mxu1 %v5366_v43 }
 0x2c6   :  { %3026 = vmatprep.subr.bf16.mxu1 %v5371_v44 }
 0x2c9   :  { %3027 = vmatpush1.bf16.msra.mxu1 %v5369_v45 }
 0x2ca   :  { %3028 = vmatprep.subr.bf16.mxu1 %v5374_v46 }
 0x2cd   :  { %3029 = vmatpush1.bf16.msra.mxu1 %v5372_v47 }
 0x2ce   :  { %3039 = vmatprep.subr.bf16.mxu1 %v5377_v48 }
 0x2d0   :  { %3031 = vmatmul.mubr.bf16.vlgmr.msra.gmra.mrb[4].mxu1 %v2365_v51 }
 0x2d1   :  { %3040 = vmatpush1.bf16.msra.mxu1 %v5375_v50 }
 0x2d2   :  { %3041 = vmatprep.subr.bf16.mxu1 %v5380_v52 }
 0x2d5   :  { %3042 = vmatpush1.bf16.msra.mxu1 %v5378_v53 }
 0x2d6   :  { %3043 = vmatprep.subr.bf16.mxu1 %v5383_v54 }
 0x2d9   :  { %3044 = vmatpush1.bf16.msra.mxu1 %v5381_v55 }
 0x2da   :  { %3045 = vmatprep.subr.bf16.mxu1 %v5386_v56 }
 0x2dd   :  { %3046 = vmatpush1.bf16.msra.mxu1 %v5384_v57 }
 0x2de   :  { %3047 = vmatprep.subr.bf16.mxu1 %v5389_v58 }
 0x2e1   :  { %3048 = vmatpush1.bf16.msra.mxu1 %v5387_v59 }
 0x2e2   :  { %3049 = vmatprep.subr.bf16.mxu1 %v5392_v60 }
 0x2e5   :  { %3050 = vmatpush1.bf16.msra.mxu1 %v5390_v61 }
 0x2e6   :  { %3051 = vmatprep.subr.bf16.mxu1 %v5395_v62 }
 0x2e9   :  { %3052 = vmatpush1.bf16.msra.mxu1 %v5393_v63 }
 0x2ea   :  { %3053 = vmatprep.subr.bf16.mxu1 %v5398_v1 }
 0x2ed   :  { %3054 = vmatpush1.bf16.msra.mxu1 %v5396_v2  ;;  %v5425_v2 = vld [vmem:[#allocation12 + $0x4] ss:$8 sps:$4 sm:$0xff]  }
 0x2ee   :  { %3055 = vmatprep.subr.bf16.mxu1 %v5401_v3  ;;  %v3255_v3 = vld [vmem:[#allocation2] sm:$0xf] }
 0x2f1   :  { %3056 = vmatpush1.bf16.msra.mxu1 %v5399_v7  ;;  %v5423_v7 = vld [vmem:[#allocation12] ss:$8 sps:$4 sm:$0xff]  }
 0x2f2   :  { %3057 = vmatprep.subr.bf16.mxu1 %v5404_v4  ;;  %v5428_v4 = vld [vmem:[#allocation12 + $0x14] ss:$8 sps:$4 sm:$0xff]  }
 0x2f5   :  { %3058 = vmatpush1.bf16.msra.mxu1 %v5402_v10  ;;  %v5426_v10 = vld [vmem:[#allocation12 + $0x10] ss:$8 sps:$4 sm:$0xff]  }
 0x2f6   :  { %3059 = vmatprep.subr.bf16.mxu1 %v5407_v5  ;;  %v5431_v5 = vld [vmem:[#allocation12 + $0x24] ss:$8 sps:$4 sm:$0xff]  }
 0x2f9   :  { %3060 = vmatpush1.bf16.msra.mxu1 %v5405_v6  ;;  %v5429_v6 = vld [vmem:[#allocation12 + $0x20] ss:$8 sps:$4 sm:$0xff]  }
 0x2fa   :  { %3061 = vmatprep.subr.bf16.mxu1 %v5410_v8  ;;  %v5434_v8 = vld [vmem:[#allocation12 + $0x34] ss:$8 sps:$4 sm:$0xff]  }
 0x2fd   :  { %3062 = vmatpush1.bf16.msra.mxu1 %v5408_v9  ;;  %v5432_v9 = vld [vmem:[#allocation12 + $0x30] ss:$8 sps:$4 sm:$0xff]  }
 0x2fe   :  { %3063 = vmatprep.subr.bf16.mxu1 %v5413_v11  ;;  %v5437_v11 = vld [vmem:[#allocation12 + $0x44] ss:$8 sps:$4 sm:$0xff]  }
 0x301   :  { %3064 = vmatpush1.bf16.msra.mxu1 %v5411_v12  ;;  %v5435_v12 = vld [vmem:[#allocation12 + $0x40] ss:$8 sps:$4 sm:$0xff]  }
 0x302   :  { %3065 = vmatprep.subr.bf16.mxu1 %v5416_v13  ;;  %v5440_v13 = vld [vmem:[#allocation12 + $0x54] ss:$8 sps:$4 sm:$0xff]  }
 0x305   :  { %3066 = vmatpush1.bf16.msra.mxu1 %v5414_v14  ;;  %v5438_v14 = vld [vmem:[#allocation12 + $0x50] ss:$8 sps:$4 sm:$0xff]  }
 0x306   :  { %3067 = vmatprep.subr.bf16.mxu1 %v5419_v0  ;;  %v5443_v0 = vld [vmem:[#allocation12 + $0x64] ss:$8 sps:$4 sm:$0xff]  }
 0x309   :  { %3068 = vmatpush1.bf16.msra.mxu1 %v5417_v15  ;;  %v5441_v15 = vld [vmem:[#allocation12 + $0x60] ss:$8 sps:$4 sm:$0xff]  }
 0x30a   :  { %3069 = vmatprep.subr.bf16.mxu1 %v5422_v20  ;;  %v5446_v20 = vld [vmem:[#allocation12 + $0x74] ss:$8 sps:$4 sm:$0xff]  }
 0x30d   :  { %3070 = vmatpush1.bf16.msra.mxu1 %v5420_v16  ;;  %v5444_v16 = vld [vmem:[#allocation12 + $0x70] ss:$8 sps:$4 sm:$0xff]  }
 0x33e   :  { %v2350_v23 = vpop.f32.mrb[4].mxu0 }
 0x33f   :  { %v4767_v24 = vadd.f32 %v2350_v23, %v537_v21  ;;  %v2352_v25 = vpop.f32.mrb[5].mxu0  ;;  %v5452_v21 = vld [vmem:[#allocation12 + $0x94] ss:$8 sps:$4 sm:$0xff]   ;;  %v5455_v23 = vld [vmem:[#allocation12 + $0xa4] ss:$8 sps:$4 sm:$0xff]  }
 0x340   :  { %v4768_v26 = vadd.f32 %v2352_v25, %v541_v22  ;;  %v2354_v27 = vpop.f32.mrb[6].mxu0  ;;  %v5450_v22 = vld [vmem:[#allocation12 + $0x90] ss:$8 sps:$4 sm:$0xff]   ;;  %v5458_v25 = vld [vmem:[#allocation12 + $0xb4] ss:$8 sps:$4 sm:$0xff]  }
 0x341   :  { %5591 = vtanh.f32 %v4767_v24  ;;  %v2355_v28 = vpop.f32.mrb[7].mxu0  ;;  %v5453_v24 = vld [vmem:[#allocation12 + $0xa0] ss:$8 sps:$4 sm:$0xff]   ;;  %v5461_v27 = vld [vmem:[#allocation12 + $0xc4] ss:$8 sps:$4 sm:$0xff]  }
 0x342   :  { %5593 = vtanh.f32 %v4768_v26  ;;  %v5456_v26 = vld [vmem:[#allocation12 + $0xb0] ss:$8 sps:$4 sm:$0xff]   ;;  %v5459_v28 = vld [vmem:[#allocation12 + $0xc0] ss:$8 sps:$4 sm:$0xff]  }
 0x34b   :  { %v5592_v30 = vpop.eup %5591 }
 0x34c   :  { %v5594_v36 = vpop.eup %5593  ;;  %v2367_v32 = vpack.c.bf16 %v5592_v30, %v5592_v30  ;;  %v5464_v30 = vld [vmem:[#allocation12 + $0xd4] ss:$8 sps:$4 sm:$0xff]  }
 0x34d   :  { %v2368_v31 = vpack.c.bf16 %v5594_v36, %v5594_v36  ;;  %v5462_v36 = vld [vmem:[#allocation12 + $0xd0] ss:$8 sps:$4 sm:$0xff]  }
 0x34f   :  { %3071 = vmatprep.mubr.bf16.mxu1 %v2368_v31  ;;  %v5467_v31 = vld [vmem:[#allocation12 + $0xe4] ss:$8 sps:$4 sm:$0xff]  }
 0x350   :  { %3072 = vmatmul.mubr.bf16.vlgmr.msra.gmra.mrb[4].mxu1 %v2367_v32  ;;  %v5465_v32 = vld [vmem:[#allocation12 + $0xe0] ss:$8 sps:$4 sm:$0xff]  }
 0x351   :  { %3296 = vmatprep.mubr.bf16.mxu1 %v5914_v29 }
 0x35e   :  { %v3228_v35 = vpop.f32.mrb[8].mxu0 }
 0x35f   :  { %v3229_v37 = vadd.f32 %v3228_v35, %v3107_v34  ;;  %v3230_v40 = vpop.f32.mrb[9].mxu0  ;;  %v5519_v35 = vld [vmem:[#allocation16] ss:$8 sps:$4 sm:$0xff]  }
 0x360   :  { %v3231_v41 = vadd.f32 %v3230_v40, %v3111_v38  ;;  %v3232_v42 = vpop.f32.mrb[10].mxu0  ;;  %v5524_v40 = vld [vmem:[#allocation16 + $0x14] ss:$8 sps:$4 sm:$0xff]  }
 0x361   :  { %v3233_v43 = vadd.f32 %v3232_v42, %v3107_v34  ;;  %v3234_v44 = vpop.f32.mrb[11].mxu0  ;;  %v3247_v46 = vmax.f32 %v3229_v37, 0.0  ;;  %v5521_v37 = vld [vmem:[#allocation16 + $0x4] ss:$8 sps:$4 sm:$0xff]  }
 0x362   :  { %v3235_v45 = vadd.f32 %v3234_v44, %v3111_v38  ;;  %v3248_v48 = vmax.f32 %v3231_v41, 0.0  ;;  %3780 = vmatprep.subr.bf16.mxu0 %v5521_v37  ;;  %v5522_v41 = vld [vmem:[#allocation16 + $0x10] ss:$8 sps:$4 sm:$0xff]   ;;  %v5527_v42 = vld [vmem:[#allocation16 + $0x24] ss:$8 sps:$4 sm:$0xff]  }
 0x363   :  { %v3249_v47 = vmax.f32 %v3233_v43, 0.0  ;;  %3781 = vmatpush1.bf16.msra.mxu0 %v5519_v35  ;;  %v5525_v43 = vld [vmem:[#allocation16 + $0x20] ss:$8 sps:$4 sm:$0xff]   ;;  %v5530_v44 = vld [vmem:[#allocation16 + $0x34] ss:$8 sps:$4 sm:$0xff]  }
 0x364   :  { %v3250_v49 = vmax.f32 %v3235_v45, 0.0  ;;  %3782 = vmatprep.subr.bf16.mxu0 %v5524_v40  ;;  %v5528_v45 = vld [vmem:[#allocation16 + $0x30] ss:$8 sps:$4 sm:$0xff]   ;;  %v5503_v37 = vld [vmem:[#allocation15 + $0xa4] ss:$8 sps:$4 sm:$0xff]  }
 0x365   :  { %v3256_v50 = vpack.c.bf16 %v3249_v47, %v3247_v46  ;;  %v5533_v46 = vld [vmem:[#allocation16 + $0x44] ss:$8 sps:$4 sm:$0xff]   ;;  %v5531_v47 = vld [vmem:[#allocation16 + $0x40] ss:$8 sps:$4 sm:$0xff]   ;;  %v5498_v35 = vld [vmem:[#allocation15 + $0x90] ss:$8 sps:$4 sm:$0xff]  }
 0x366   :  { %v3257_v51 = vpack.c.bf16 %v3250_v49, %v3248_v48  ;;  %v3238_v29 = vpop.f32.mrb[12].mxu0  ;;  %v5536_v48 = vld [vmem:[#allocation16 + $0x54] ss:$8 sps:$4 sm:$0xff]   ;;  %v5534_v49 = vld [vmem:[#allocation16 + $0x50] ss:$8 sps:$4 sm:$0xff]  }
 0x367   :  { %v3239_v52 = vadd.f32 %v3238_v29, %v3107_v34  ;;  %v3240_v53 = vpop.f32.mrb[13].mxu0  ;;  %3783 = vmatpush1.bf16.msra.mxu0 %v5522_v41  ;;  %v5537_v29 = vld [vmem:[#allocation16 + $0x60] ss:$8 sps:$4 sm:$0xff]   ;;  %v5506_v41 = vld [vmem:[#allocation15 + $0xb4] ss:$8 sps:$4 sm:$0xff]  }
 0x368   :  { %v3241_v54 = vadd.f32 %v3240_v53, %v3111_v38  ;;  %v3242_v55 = vpop.f32.mrb[14].mxu0  ;;  %3264 = vmatprep.subr.bf16.mxu1 %v3257_v51  ;;  %3784 = vmatprep.subr.bf16.mxu0 %v5527_v42  ;;  %v5542_v53 = vld [vmem:[#allocation16 + $0x74] ss:$8 sps:$4 sm:$0xff]   ;;  %v5501_v40 = vld [vmem:[#allocation15 + $0xa0] ss:$8 sps:$4 sm:$0xff]  }
 0x369   :  { %v3243_v56 = vadd.f32 %v3242_v55, %v3107_v34  ;;  %v3244_v57 = vpop.f32.mrb[15].mxu0  ;;  %3265 = vmatpush1.bf16.msra.mxu1 %v3256_v50  ;;  %v3251_v59 = vmax.f32 %v3239_v52, 0.0  ;;  %v5468_v34 = vld [vmem:[#allocation12 + $0xf0] ss:$8 sps:$4 sm:$0xff]  }
 0x36a   :  { %v3245_v58 = vadd.f32 %v3244_v57, %v3111_v38  ;;  %v3252_v61 = vmax.f32 %v3241_v54, 0.0  ;;  %v5473_v38 = vld [vmem:[#allocation15 + $0x4] ss:$8 sps:$4 sm:$0xff]   ;;  %v5504_v42 = vld [vmem:[#allocation15 + $0xb0] ss:$8 sps:$4 sm:$0xff]  }
 0x36b   :  { %v3253_v60 = vmax.f32 %v3243_v56, 0.0  ;;  %3785 = vmatpush1.bf16.msra.mxu0 %v5525_v43  ;;  %v5539_v50 = vld [vmem:[#allocation16 + $0x64] ss:$8 sps:$4 sm:$0xff]   ;;  %v5540_v56 = vld [vmem:[#allocation16 + $0x70] ss:$8 sps:$4 sm:$0xff]  }
 0x36c   :  { %v3254_v62 = vmax.f32 %v3245_v58, 0.0  ;;  %3786 = vmatprep.subr.bf16.mxu0 %v5530_v44  ;;  %v5545_v57 = vld [vmem:[#allocation16 + $0x84] ss:$8 sps:$4 sm:$0xff]   ;;  %v5543_v58 = vld [vmem:[#allocation16 + $0x80] ss:$8 sps:$4 sm:$0xff]  }
 0x36d   :  { %v3258_v63 = vpack.c.bf16 %v3253_v60, %v3251_v59  ;;  %v5548_v59 = vld [vmem:[#allocation16 + $0x94] ss:$8 sps:$4 sm:$0xff]   ;;  %v5546_v60 = vld [vmem:[#allocation16 + $0x90] ss:$8 sps:$4 sm:$0xff]   ;;  %v5509_v43 = vld [vmem:[#allocation15 + $0xc4] ss:$8 sps:$4 sm:$0xff]  }
 0x36e   :  { %v3259_v1 = vpack.c.bf16 %v3254_v62, %v3252_v61  ;;  %v5551_v61 = vld [vmem:[#allocation16 + $0xa4] ss:$8 sps:$4 sm:$0xff]   ;;  %v5549_v62 = vld [vmem:[#allocation16 + $0xa0] ss:$8 sps:$4 sm:$0xff]  }
 0x36f   :  { %3787 = vmatpush1.bf16.msra.mxu0 %v5528_v45  ;;  %v5507_v44 = vld [vmem:[#allocation15 + $0xc0] ss:$8 sps:$4 sm:$0xff]   ;;  %v5512_v45 = vld [vmem:[#allocation15 + $0xd4] ss:$8 sps:$4 sm:$0xff]  }
 0x370   :  { %3266 = vmatprep.subr.bf16.mxu1 %v3259_v1  ;;  %3788 = vmatprep.subr.bf16.mxu0 %v5533_v46  ;;  %v5552_v1 = vld [vmem:[#allocation16 + $0xb0] ss:$8 sps:$4 sm:$0xff]  }
 0x371   :  { %3267 = vmatpush1.bf16.msra.mxu1 %v3258_v63  ;;  %v5554_v63 = vld [vmem:[#allocation16 + $0xb4] ss:$8 sps:$4 sm:$0xff]   ;;  %v5510_v46 = vld [vmem:[#allocation15 + $0xd0] ss:$8 sps:$4 sm:$0xff]  }
 0x372   :  { %3511 = vmatprep.subr.bf16.mxu1 %v5425_v2  ;;  %v5557_v2 = vld [vmem:[#allocation16 + $0xc4] ss:$8 sps:$4 sm:$0xff]  }
 0x373   :  { %3789 = vmatpush1.bf16.msra.mxu0 %v5531_v47  ;;  %v5515_v47 = vld [vmem:[#allocation15 + $0xe4] ss:$8 sps:$4 sm:$0xff]  }
 0x374   :  { %4627 = vmatmul.mubr.msk.bf16.vlgmr.msra.gmra.mrb[8].mxu1 %vm3260_vm0, %v3255_v3  ;;  %3790 = vmatprep.subr.bf16.mxu0 %v5536_v48  ;;  %v5555_v3 = vld [vmem:[#allocation16 + $0xc0] ss:$8 sps:$4 sm:$0xff]  }
 0x375   :  { %3512 = vmatpush1.bf16.msra.mxu1 %v5423_v7  ;;  %v5560_v7 = vld [vmem:[#allocation16 + $0xd4] ss:$8 sps:$4 sm:$0xff]   ;;  %v5513_v48 = vld [vmem:[#allocation15 + $0xe0] ss:$8 sps:$4 sm:$0xff]  }
 0x376   :  { %3513 = vmatprep.subr.bf16.mxu1 %v5428_v4  ;;  %v5558_v4 = vld [vmem:[#allocation16 + $0xd0] ss:$8 sps:$4 sm:$0xff]  }
 0x377   :  { %3791 = vmatpush1.bf16.msra.mxu0 %v5534_v49 }
 0x378   :  { %3792 = vmatprep.subr.bf16.mxu0 %v5539_v50  ;;  %v5518_v50 = vld [vmem:[#allocation15 + $0xf4] ss:$8 sps:$4 sm:$0xff]  }
 0x379   :  { %3514 = vmatpush1.bf16.msra.mxu1 %v5426_v10  ;;  %v6562_v10 = vld [vmem:[#allocation7] sm:$0x3] }
 0x37a   :  { %3515 = vmatprep.subr.bf16.mxu1 %v5431_v5  ;;  %v5563_v5 = vld [vmem:[#allocation16 + $0xe4] ss:$8 sps:$4 sm:$0xff]   ;;  %v2470_v49 = vrot.slane %v6562_v10, %v6333_v17 }
 0x37b   :  { %3793 = vmatpush1.bf16.msra.mxu0 %v5537_v29  ;;  %v5516_v29 = vld [vmem:[#allocation15 + $0xf0] ss:$8 sps:$4 sm:$0xff]  }
 0x37c   :  { %3794 = vmatprep.subr.bf16.mxu0 %v5542_v53 }
 0x37d   :  { %3516 = vmatpush1.bf16.msra.mxu1 %v5429_v6  ;;  %v2474_v6 = vrot.slane %v6562_v10, %v6338_v39  ;;  %v5570_v10 = vld [vmem:[#allocation19 + $0x8] sm:$0xff]  }
 0x37e   :  { %3517 = vmatprep.subr.bf16.mxu1 %v5434_v8  ;;  %v5561_v8 = vld [vmem:[#allocation16 + $0xe0] ss:$8 sps:$4 sm:$0xff]  }
 0x37f   :  { %3795 = vmatpush1.bf16.msra.mxu0 %v5540_v56  ;;  %v5567_v56 = vld [vmem:[#allocation19 + $0x40] sm:$0xff]  }
 0x380   :  { %3796 = vmatprep.subr.bf16.mxu0 %v5545_v57  ;;  %v3339_v57 = vld [vmem:[#allocation13] sm:$0x3] }
 0x381   :  { %3518 = vmatpush1.bf16.msra.mxu1 %v5432_v9 }
 0x382   :  { %3519 = vmatprep.subr.bf16.mxu1 %v5437_v11 }
 0x383   :  { %3797 = vmatpush1.bf16.msra.mxu0 %v5543_v58  ;;  %v3344_v58 = vrot.slane %v3339_v57, %v6333_v17 }
 0x384   :  { %3798 = vmatprep.subr.bf16.mxu0 %v5548_v59  ;;  %v3348_v59 = vrot.slane %v3339_v57, %v6338_v39 }
 0x385   :  { %3520 = vmatpush1.bf16.msra.mxu1 %v5435_v12 }
 0x386   :  { %3521 = vmatprep.subr.bf16.mxu1 %v5440_v13 }
 0x387   :  { %3799 = vmatpush1.bf16.msra.mxu0 %v5546_v60 }
 0x388   :  { %3800 = vmatprep.subr.bf16.mxu0 %v5551_v61 }
 0x389   :  { %3522 = vmatpush1.bf16.msra.mxu1 %v5438_v14 }
 0x38a   :  { %3523 = vmatprep.subr.bf16.mxu1 %v5443_v0  ;;  %v5471_v0 = vld [vmem:[#allocation15] ss:$8 sps:$4 sm:$0xff]  }
 0x38b   :  { %3801 = vmatpush1.bf16.msra.mxu0 %v5549_v62 }
 0x38c   :  { %3802 = vmatprep.subr.bf16.mxu0 %v5554_v63 }
 0x38d   :  { %3524 = vmatpush1.bf16.msra.mxu1 %v5441_v15 }
 0x38e   :  { %3525 = vmatprep.subr.bf16.mxu1 %v5446_v20 }
 0x38f   :  { %3803 = vmatpush1.bf16.msra.mxu0 %v5552_v1 }
 0x390   :  { %3804 = vmatprep.subr.bf16.mxu0 %v5557_v2 }
 0x391   :  { %3526 = vmatpush1.bf16.msra.mxu1 %v5444_v16  ;;  %v5476_v16 = vld [vmem:[#allocation15 + $0x14] ss:$8 sps:$4 sm:$0xff]  }
 0x392   :  { %3527 = vmatprep.subr.bf16.mxu1 %v5449_v18 }
 0x393   :  { %3805 = vmatpush1.bf16.msra.mxu0 %v5555_v3  ;;  %v5568_v3 = vld [vmem:[#allocation19] sm:$0xff]  }
 0x394   :  { %3806 = vmatprep.subr.bf16.mxu0 %v5560_v7 }
 0x395   :  { %3528 = vmatpush1.bf16.msra.mxu1 %v5447_v19  ;;  %v5474_v19 = vld [vmem:[#allocation15 + $0x10] ss:$8 sps:$4 sm:$0xff]  }
 0x396   :  { %3529 = vmatprep.subr.bf16.mxu1 %v5452_v21  ;;  %v5479_v21 = vld [vmem:[#allocation15 + $0x24] ss:$8 sps:$4 sm:$0xff]  }
 0x397   :  { %3807 = vmatpush1.bf16.msra.mxu0 %v5558_v4  ;;  %v5569_v4 = vld [vmem:[#allocation19 + $0x48] sm:$0xff]  }
 0x398   :  { %3808 = vmatprep.subr.bf16.mxu0 %v5563_v5  ;;  %v5571_v5 = vld [vmem:[#allocation19 + $0x50] sm:$0xff]  }
 0x399   :  { %3530 = vmatpush1.bf16.msra.mxu1 %v5450_v22  ;;  %v5477_v22 = vld [vmem:[#allocation15 + $0x20] ss:$8 sps:$4 sm:$0xff]  }
 0x39a   :  { %3531 = vmatprep.subr.bf16.mxu1 %v5455_v23  ;;  %v5482_v23 = vld [vmem:[#allocation15 + $0x34] ss:$8 sps:$4 sm:$0xff]  }
 0x39b   :  { %3809 = vmatpush1.bf16.msra.mxu0 %v5561_v8  ;;  %v5573_v8 = vld [vmem:[#allocation19 + $0x58] sm:$0xff]  }
 0x39d   :  { %3532 = vmatpush1.bf16.msra.mxu1 %v5453_v24  ;;  %v5480_v24 = vld [vmem:[#allocation15 + $0x30] ss:$8 sps:$4 sm:$0xff]  }
 0x39e   :  { %3533 = vmatprep.subr.bf16.mxu1 %v5458_v25  ;;  %v5485_v25 = vld [vmem:[#allocation15 + $0x44] ss:$8 sps:$4 sm:$0xff]  }
 0x3a1   :  { %3534 = vmatpush1.bf16.msra.mxu1 %v5456_v26  ;;  %v5483_v26 = vld [vmem:[#allocation15 + $0x40] ss:$8 sps:$4 sm:$0xff]  }
 0x3a2   :  { %3535 = vmatprep.subr.bf16.mxu1 %v5461_v27  ;;  %v5488_v27 = vld [vmem:[#allocation15 + $0x54] ss:$8 sps:$4 sm:$0xff]  }
 0x3a5   :  { %3536 = vmatpush1.bf16.msra.mxu1 %v5459_v28  ;;  %v5486_v28 = vld [vmem:[#allocation15 + $0x50] ss:$8 sps:$4 sm:$0xff]  }
 0x3a6   :  { %3537 = vmatprep.subr.bf16.mxu1 %v5464_v30  ;;  %v5491_v30 = vld [vmem:[#allocation15 + $0x64] ss:$8 sps:$4 sm:$0xff]  }
 0x3a9   :  { %3538 = vmatpush1.bf16.msra.mxu1 %v5462_v36  ;;  %v5489_v36 = vld [vmem:[#allocation15 + $0x60] ss:$8 sps:$4 sm:$0xff]  }
 0x3aa   :  { %3539 = vmatprep.subr.bf16.mxu1 %v5467_v31  ;;  %v5494_v31 = vld [vmem:[#allocation15 + $0x74] ss:$8 sps:$4 sm:$0xff]  }
 0x3ad   :  { %3540 = vmatpush1.bf16.msra.mxu1 %v5465_v32  ;;  %v5492_v32 = vld [vmem:[#allocation15 + $0x70] ss:$8 sps:$4 sm:$0xff]  }
 0x3ae   :  { %3541 = vmatprep.subr.bf16.mxu1 %v5470_v33  ;;  %v5497_v33 = vld [vmem:[#allocation15 + $0x84] ss:$8 sps:$4 sm:$0xff]  }
 0x3b1   :  { %3542 = vmatpush1.bf16.msra.mxu1 %v5468_v34  ;;  %v5495_v34 = vld [vmem:[#allocation15 + $0x80] ss:$8 sps:$4 sm:$0xff]  }
 0x3b2   :  { %3981 = vmatprep.subr.bf16.mxu1 %v5473_v38  ;;  %v5500_v38 = vld [vmem:[#allocation15 + $0x94] ss:$8 sps:$4 sm:$0xff]  }
 0x423   :  { %v6560_v51 = vpop.f32.mrb[4].mxu1 }
 0x424   :  { %v3075_v52 = vpop.f32.mrb[5].mxu1 }
 0x425   :  { %v3077_v54 = vpop.f32.mrb[6].mxu1  ;;  %v4770_v9 = vadd.f32 %v3075_v52, %v2474_v6  ;;  %v4769_v52 = vadd.f32 %v6560_v51, %v2470_v49  ;;  %v5572_v6 = vld [vmem:[#allocation19 + $0x10] sm:$0xff]  }
 0x426   :  { %v3078_v55 = vpop.f32.mrb[7].mxu1  ;;  %v5566_v54 = vld [vmem:[#allocation16 + $0xf4] ss:$8 sps:$4 sm:$0xff]  }
 0x427   :  { %v3553_v18 = vpack.c.bf16 %v4770_v9, %v4770_v9  ;;  %v3552_v53 = vpack.c.bf16 %v4769_v52, %v4769_v52  ;;  %v5564_v55 = vld [vmem:[#allocation16 + $0xf0] ss:$8 sps:$4 sm:$0xff]   ;;  %3810 = vmatprep.subr.bf16.mxu0 %v5566_v54 }
 0x428   :  { %3811 = vmatpush1.bf16.msra.mxu0 %v5564_v55  ;;  %v5574_v9 = vld [vmem:[#allocation19 + $0x18] sm:$0xff]  }
 0x429   :  { %4741 = vmatprep.subr.bf16.mxu0 %v5567_v56 }
 0x447   :  { %v3298_v11 = vpop.f32.mrb[8].mxu1 }
 0x448   :  { %v3300_v12 = vpop.f32.mrb[9].mxu1  ;;  %v3305_v15 = vpack.c.bf16 %v3298_v11, %v3298_v11  ;;  %v5575_v11 = vld [vmem:[#allocation19 + $0x60] sm:$0xff]  }
 0x449   :  { %v3306_v13 = vpack.c.bf16 %v3300_v12, %v3300_v12  ;;  %v3302_v14 = vpop.f32.mrb[10].mxu1  ;;  %v5576_v12 = vld [vmem:[#allocation19 + $0x20] sm:$0xff]  }
 0x44a   :  { %v3303_v20 = vpop.f32.mrb[11].mxu1 }
 0x44b   :  { %3543 = vmatprep.mubr.bf16.mxu1 %v3306_v13  ;;  %v5577_v13 = vld [vmem:[#allocation19 + $0x68] sm:$0xff]  }
 0x44c   :  { %3544 = vmatmul.mubr.bf16.vlgmr.msra.gmra.mrb[12].mxu1 %v3305_v15 }
 0x44d   :  { %3982 = vmatpush1.bf16.msra.mxu1 %v5471_v0  ;;  %4013 = vmatprep.mubr.bf16.mxu1 %v3553_v18  ;;  %v5579_v18 = vld [vmem:[#allocation19 + $0x70] sm:$0xff]  }
 0x44e   :  { %3983 = vmatprep.subr.bf16.mxu1 %v5476_v16  ;;  %v5578_v16 = vld [vmem:[#allocation19 + $0x28] sm:$0xff]  }
 0x451   :  { %3984 = vmatpush1.bf16.msra.mxu1 %v5474_v19  ;;  %v5580_v19 = vld [vmem:[#allocation19 + $0x30] sm:$0xff]  }
 0x452   :  { %3985 = vmatprep.subr.bf16.mxu1 %v5479_v21  ;;  %v5581_v21 = vld [vmem:[#allocation19 + $0x78] sm:$0xff]  }
 0x455   :  { %3986 = vmatpush1.bf16.msra.mxu1 %v5477_v22  ;;  %v5582_v22 = vld [vmem:[#allocation19 + $0x38] sm:$0xff]  }
 0x456   :  { %3987 = vmatprep.subr.bf16.mxu1 %v5482_v23  ;;  %v4022_v23 = vld [vmem:[#allocation18] sm:$0x3] }
 0x459   :  { %3988 = vmatpush1.bf16.msra.mxu1 %v5480_v24  ;;  %v4027_v24 = vrot.slane %v4022_v23, %v6333_v17 }
 0x45a   :  { %3989 = vmatprep.subr.bf16.mxu1 %v5485_v25 }
 0x45d   :  { %3990 = vmatpush1.bf16.msra.mxu1 %v5483_v26  ;;  %v4031_v26 = vrot.slane %v4022_v23, %v6338_v39 }
 0x45e   :  { %3991 = vmatprep.subr.bf16.mxu1 %v5488_v27 }
 0x461   :  { %3992 = vmatpush1.bf16.msra.mxu1 %v5486_v28 }
 0x462   :  { %3993 = vmatprep.subr.bf16.mxu1 %v5491_v30 }
 0x465   :  { %3994 = vmatpush1.bf16.msra.mxu1 %v5489_v36 }
 0x466   :  { %3995 = vmatprep.subr.bf16.mxu1 %v5494_v31 }
 0x469   :  { %3996 = vmatpush1.bf16.msra.mxu1 %v5492_v32 }
 0x46a   :  { %3997 = vmatprep.subr.bf16.mxu1 %v5497_v33 }
 0x46d   :  { %3998 = vmatpush1.bf16.msra.mxu1 %v5495_v34 }
 0x46e   :  { %3999 = vmatprep.subr.bf16.mxu1 %v5500_v38 }
 0x471   :  { %4000 = vmatpush1.bf16.msra.mxu1 %v5498_v35 }
 0x472   :  { %4001 = vmatprep.subr.bf16.mxu1 %v5503_v37 }
 0x475   :  { %4002 = vmatpush1.bf16.msra.mxu1 %v5501_v40 }
 0x476   :  { %4003 = vmatprep.subr.bf16.mxu1 %v5506_v41  ;;  %v4724_v41 = vld [vmem:[#allocation21] ss:$0 sm:$0xff] }
 0x479   :  { %4004 = vmatpush1.bf16.msra.mxu1 %v5504_v42 }
 0x47a   :  { %4005 = vmatprep.subr.bf16.mxu1 %v5509_v43 }
 0x47d   :  { %4006 = vmatpush1.bf16.msra.mxu1 %v5507_v44 }
 0x47e   :  { %4007 = vmatprep.subr.bf16.mxu1 %v5512_v45 }
 0x481   :  { %4008 = vmatpush1.bf16.msra.mxu1 %v5510_v46 }
 0x482   :  { %4009 = vmatprep.subr.bf16.mxu1 %v5515_v47 }
 0x485   :  { %4010 = vmatpush1.bf16.msra.mxu1 %v5513_v48 }
 0x486   :  { %4011 = vmatprep.subr.bf16.mxu1 %v5518_v50 }
 0x489   :  { %4012 = vmatpush1.bf16.msra.mxu1 %v5516_v29 }
 0x48c   :  { %4014 = vmatmul.mubr.bf16.vlgmr.msra.gmra.mrb[16].mxu1 %v3552_v53 }
 0x51f   :  { %v3545_v60 = vpop.f32.mrb[12].mxu1 }
 0x520   :  { %v3546_v61 = vadd.f32 %v3545_v60, %v3344_v58  ;;  %v3547_v62 = vpop.f32.mrb[13].mxu1 }
 0x521   :  { %v3548_v63 = vadd.f32 %v3547_v62, %v3348_v59  ;;  %v3549_v51 = vpop.f32.mrb[14].mxu1 }
 0x522   :  { %v3550_v1 = vpop.f32.mrb[15].mxu1  ;;  %v3586_v7 = vpack.c.bf16 %v3546_v61, %v3546_v61 }
 0x523   :  { %v3587_v2 = vpack.c.bf16 %v3548_v63, %v3548_v63 }
 0x525   :  { %3812 = vmatprep.mubr.bf16.mxu0 %v3587_v2 }
 0x526   :  { %3813 = vmatmul.mubr.bf16.vlgmr.msra.gmra.mrb[16].mxu0 %v3586_v7 }
 0x527   :  { %4742 = vmatpush3.bf16.msra.mxu0 %v5568_v3 }
 0x528   :  { %4743 = vmatprep.subr.bf16.mxu0 %v5569_v4 }
 0x52b   :  { %4744 = vmatpush3.bf16.msra.mxu0 %v5570_v10 }
 0x52c   :  { %4745 = vmatprep.subr.bf16.mxu0 %v5571_v5 }
 0x52f   :  { %4746 = vmatpush3.bf16.msra.mxu0 %v5572_v6 }
 0x530   :  { %4747 = vmatprep.subr.bf16.mxu0 %v5573_v8 }
 0x533   :  { %4748 = vmatpush3.bf16.msra.mxu0 %v5574_v9 }
 0x534   :  { %4749 = vmatprep.subr.bf16.mxu0 %v5575_v11 }
 0x537   :  { %4750 = vmatpush3.bf16.msra.mxu0 %v5576_v12 }
 0x538   :  { %4751 = vmatprep.subr.bf16.mxu0 %v5577_v13 }
 0x53b   :  { %4752 = vmatpush3.bf16.msra.mxu0 %v5578_v16 }
 0x53c   :  { %4753 = vmatprep.subr.bf16.mxu0 %v5579_v18 }
 0x53f   :  { %4754 = vmatpush3.bf16.msra.mxu0 %v5580_v19 }
 0x540   :  { %4755 = vmatprep.subr.bf16.mxu0 %v5581_v21 }
 0x543   :  { %4756 = vmatpush3.bf16.msra.mxu0 %v5582_v22 }
 0x55f   :  { %v4015_v14 = vpop.f32.mrb[16].mxu1 }
 0x560   :  { %v4017_v0 = vpop.f32.mrb[17].mxu1 }
 0x561   :  { %v4019_v15 = vpop.f32.mrb[18].mxu1 }
 0x562   :  { %v4020_v20 = vpop.f32.mrb[19].mxu1 }
 0x5f9   :  { %v3814_v25 = vpop.f32.mrb[16].mxu0 }
 0x5fa   :  { %v4016_v27 = vadd.f32 %v4015_v14, %v3814_v25  ;;  %v3816_v28 = vpop.f32.mrb[17].mxu0 }
 0x5fb   :  { %v4018_v30 = vadd.f32 %v4017_v0, %v3816_v28  ;;  %v3818_v36 = vpop.f32.mrb[18].mxu0 }
 0x5fc   :  { %v4034_v31 = vadd.f32 %v4027_v24, %v4016_v27  ;;  %v3819_v32 = vpop.f32.mrb[19].mxu0 }
 0x5fd   :  { %v4035_v33 = vadd.f32 %v4031_v26, %v4018_v30 }
 0x5fe   :  { %v4036_v34 = vmax.f32 %v4034_v31, 0.0 }
 0x5ff   :  { %v4037_v38 = vmax.f32 %v4035_v33, 0.0 }
 0x600   :  { %v4038_v37 = vpack.c.bf16 %v4036_v34, %v4036_v34 }
 0x601   :  { %v4039_v35 = vpack.c.bf16 %v4037_v38, %v4037_v38 }
 0x603   :  { %4207 = vmatprep.mubr.bf16.mxu0 %v4039_v35 }
 0x604   :  { %4208 = vmatmul.mubr.bf16.vlgmr.msra.gmra.mrb[20].mxu0 %v4038_v37 }
 0x6d7   :  { %v4757_v40 = vpop.f32.mrb[20].mxu0 }
 0x6d8   :  { %v4758_v42 = vpop.f32.mrb[21].mxu0 }
 0x6d9   :  { %v4759_v17 = vadd.f32 %v4758_v42, %v4757_v40  ;;  %v4760_v43 = vpop.f32.mrb[22].mxu0 }
 0x6da   :  { %v4761_v44 = vpop.f32.mrb[23].mxu0 }
 0x6db   :  { %v4210_v39 = vadd.f32 %v4759_v17, %v4724_v41 }
 0x6dd   :  { %4215 = vst [vmem:[%s6597_s12] sm:$0xff] %v4210_v39 }
 0x6de   :  { %4220 = vsyncpa [#allocation3], 1 }
 0x6df   :  { %4221 = vsyncpa [#allocation5], 1 }
 0x6e0   :  { %4222 = vsyncpa [#allocation8], 1 }
 0x6e1   :  { %4223 = vsyncpa [#allocation11], 1 }
 0x6e2   :  { %4224 = vsyncpa [#allocation14], 1 }
 0x6e3   :  { %4225 = vsyncpa [#allocation17], 1 }
 0x6e4   :  { %4226 = vsyncpa [#allocation20], 1 }

</bundles_post_ra>
